<compile_context>
chip_gen: v5e
topology: v5e:2x2
jax: 0.10.0
libtpu: 0.0.40
codegen_flags: <defaults>
</compile_context>

<pallas_src>
import jax
import jax.numpy as jnp
from jax import lax
from jax.experimental import pallas as pl
from jax.experimental.pallas import tpu as pltpu


def _num_grid_groups(n_batch):
    """1 grid step on single-TensorCore parts (v5e/v6e); 2 'parallel' steps on
    dual-core parts (v7x, v4/v5p megacore) so both cores get work."""
    try:
        kind = jax.devices()[0].device_kind.lower()
    except Exception:
        kind = ""
    dual_core = any(tag in kind for tag in ("v7", "v4", "v5p"))
    return 2 if (dual_core and n_batch >= 2 and n_batch % 2 == 0) else 1


def br_forward(x_nchw, w1, b1, scale, shift, w2, b2):
    """BR.forward (eval mode).  x_nchw: (N,C,H,W) f32; w1,w2: HWIO (3,3,C,C);
    b1,b2,scale,shift: (C,)."""
    N, C, H, W = x_nchw.shape
    HW = H * W

    G = _num_grid_groups(N)          # grid steps
    per = N // G                     # images per step
    L = per * HW                     # lane extent per step (multiple of 128 here)

    # (N,C,H,W) -> (G, C, per*HW): batch group folded onto the lane axis.
    x_folded = (x_nchw.reshape(G, per, C, HW)
                .transpose(0, 2, 1, 3)
                .reshape(G, C, L))

    # Tap-major flattened weights: w_flat[o, t*C + i] = w[dh, dw, i, o], t = dh*3+dw,
    # so each conv becomes ONE (C, 9C) @ (9C, L) MXU matmul.
    w1_flat = jnp.transpose(w1, (3, 0, 1, 2)).reshape(C, 9 * C)
    w2_flat = jnp.transpose(w2, (3, 0, 1, 2)).reshape(C, 9 * C)

    scale_c = scale.reshape(C, 1).astype(jnp.float32)
    # eval-mode BN folded with the conv1 bias: scale*(conv1+b1)+shift
    shift_c = (scale * b1 + shift).reshape(C, 1).astype(jnp.float32)
    b2_c = b2.reshape(C, 1).astype(jnp.float32)

    # Tiny index helpers (constant index_map => fetched once, not per step),
    # replacing the former (9,HW) f32 mask input and its per-tap broadcasts:
    # per-lane (h, w) and per-stacked-row (dh, dw); the mask itself is built
    # in-kernel from compares only (no vector div/mod).
    hw_h = jnp.repeat(jnp.arange(H, dtype=jnp.int32), W)
    hw_w = jnp.tile(jnp.arange(W, dtype=jnp.int32), H)
    coords = jnp.stack([jnp.tile(hw_h, per), jnp.tile(hw_w, per)], axis=0)   # (2, L)
    taps = jnp.array([[dh - 1, dw - 1] for dh in range(3) for dw in range(3)],
                     dtype=jnp.int32)                                        # (9, 2)
    taps = jnp.repeat(taps, C, axis=0)                                       # (9C, 2)

    # bf16 MXU operands only pay off at real-model channel counts (v6e/v7x are
    # bf16-native); at tiny C keep f32 so the f32 reference check stays tight.
    mm_dtype = jnp.bfloat16 if C >= 16 else jnp.float32

    def kernel(x_ref, w1_ref, w2_ref, scale_ref, shift_ref, b2_ref,
               coords_ref, taps_ref, out_ref, stack_ref):
        x = x_ref[...]                                        # (C, L) f32

        # Zero-padding mask for the stacked (9C, L) buffer.  valid <=> the tap
        # reads an in-bounds pixel of the SAME image, which also neutralises
        # every lane-roll wraparound (rows, columns, image boundaries).
        ph = coords_ref[0:1, :]                               # (1, L)  h per lane
        pw = coords_ref[1:2, :]                               # (1, L)  w per lane
        dh = taps_ref[:, 0:1]                                 # (9C, 1) tap row offset
        dw = taps_ref[:, 1:2]                                 # (9C, 1) tap col offset
        sh = ph + dh                                          # (9C, L)
        sw = pw + dw
        mask = ((sh >= 0) & (sh < H) & (sw >= 0) & (sw < W)).astype(jnp.float32)

        def conv3x3(src, w_flat):
            # 3x3 'same' conv as ONE MXU matmul: stack the 9 lane-rolled copies
            # of `src` along sublanes (rows [t*C, (t+1)*C)), zero the padding
            # taps with a single multiply, contract with tap-major weights.
            for dh_ in range(3):
                for dw_ in range(3):
                    s = (dh_ - 1) * W + (dw_ - 1)             # flat lane offset of tap
                    xs = src if s == 0 else pltpu.roll(src, (-s) % L, axis=1)
                    t = dh_ * 3 + dw_
                    stack_ref[t * C:(t + 1) * C, :] = xs
            stacked = (stack_ref[...] * mask).astype(mm_dtype)
            return jnp.dot(w_flat, stacked, preferred_element_type=jnp.float32)

        # conv1 -> eval-mode BatchNorm (conv1 bias folded into shift) -> ReLU
        y = jnp.maximum(
            conv3x3(x, w1_ref[...].astype(mm_dtype)) * scale_ref[...] + shift_ref[...],
            0.0)
        # TODO(synk): Dropout(0.5)/Dropout(0.1) are identity in eval mode; a
        # train-mode variant would draw masks via pltpu.prng_seed/prng_random_bits.
        # conv2 + bias + residual (read from the same x ref); lane-dense store.
        out_ref[...] = (x + conv3x3(y, w2_ref[...].astype(mm_dtype))
                        + b2_ref[...]).astype(out_ref.dtype)

    # VMEM sized from the actual blocks (double-buffered x/out, weights, scalars,
    # coords/taps) plus the stacked scratch and in-kernel temporaries, 2x headroom;
    # 16 MiB floor, 48 MiB cap (v7x has 64 MiB per TensorCore).
    # TODO(synk): once this approaches the cap (earlier on v7x than v5e/v6e), add an
    # H-tile grid axis with a 1-row halo instead of whole-group-per-step.
    blocks = 2 * (2 * C * L + 2 * 9 * C * C + 3 * C + 2 * L + 2 * 9 * C)
    temps = 3 * (9 * C * L) + 4 * (C * L)
    vmem_limit = int(min(max(2 * 4 * (blocks + temps), 16 << 20), 48 << 20))

    out_folded = pl.pallas_call(
        kernel,
        out_shape=jax.ShapeDtypeStruct((G, C, L), x_nchw.dtype),
        grid_spec=pltpu.PrefetchScalarGridSpec(
            num_scalar_prefetch=0,
            grid=(G,),
            in_specs=[
                pl.BlockSpec((None, C, L), lambda g: (g, 0, 0)),   # x (also residual)
                pl.BlockSpec((C, 9 * C), lambda g: (0, 0)),        # conv1 weights (tap-major)
                pl.BlockSpec((C, 9 * C), lambda g: (0, 0)),        # conv2 weights (tap-major)
                pl.BlockSpec((C, 1), lambda g: (0, 0)),            # bn scale
                pl.BlockSpec((C, 1), lambda g: (0, 0)),            # bn shift (+ conv1 bias)
                pl.BlockSpec((C, 1), lambda g: (0, 0)),            # conv2 bias
                pl.BlockSpec((2, L), lambda g: (0, 0)),            # per-lane (h, w)
                pl.BlockSpec((9 * C, 2), lambda g: (0, 0)),        # per-row (dh, dw)
            ],
            out_specs=pl.BlockSpec((None, C, L), lambda g: (g, 0, 0)),
            scratch_shapes=[pltpu.VMEM((9 * C, L), jnp.float32)],  # stacked conv operand
        ),
        input_output_aliases={0: 0},        # output overwrites x's (folded) HBM buffer
        compiler_params=pltpu.CompilerParams(
            dimension_semantics=("parallel",),
            vmem_limit_bytes=vmem_limit),
    )(x_folded, w1_flat, w2_flat, scale_c, shift_c, b2_c, coords, taps)

    return (out_folded.reshape(G, C, per, HW)
            .transpose(0, 2, 1, 3)
            .reshape(N, C, H, W))


def _conv3x3_ref_nchw(x, w_hwio, b):
    y = lax.conv_general_dilated(
        x, w_hwio, window_strides=(1, 1), padding=((1, 1), (1, 1)),
        dimension_numbers=("NCHW", "HWIO", "NCHW"))
    return y + b.reshape(1, -1, 1, 1)


if __name__ == "__main__":
    key = jax.random.PRNGKey(0)
    N, C, H, W = 2, 4, 16, 16
    k = jax.random.split(key, 5)

    # input in PyTorch's native NCHW layout
    x = jax.random.normal(k[0], (N, C, H, W), jnp.float32)

    # Conv2d(out_c, out_c, 3, padding=1), kaiming_normal weights (fan_in = C*9), HWIO
    std = (2.0 / (C * 9)) ** 0.5
    w1 = jax.random.normal(k[1], (3, 3, C, C), jnp.float32) * std
    w2 = jax.random.normal(k[2], (3, 3, C, C), jnp.float32) * std
    bound = 1.0 / (C * 9) ** 0.5
    b1 = jax.random.uniform(k[3], (C,), jnp.float32, -bound, bound)
    b2 = jax.random.uniform(k[4], (C,), jnp.float32, -bound, bound)

    # BatchNorm2d(out_c): weight=1, bias=0, running stats at init, eval mode
    gamma = jnp.ones((C,), jnp.float32)
    beta = jnp.zeros((C,), jnp.float32)
    running_mean = jnp.zeros((C,), jnp.float32)
    running_var = jnp.ones((C,), jnp.float32)
    eps = 1e-5
    scale = gamma / jnp.sqrt(running_var + eps)
    shift = beta - running_mean * scale

    out = jax.jit(br_forward)(x, w1, b1, scale, shift, w2, b2)
    out = jax.block_until_ready(out)

    # pure-JAX f32 reference (NCHW).  Note: if the bf16 MXU-operand path is taken
    # (C >= 16 in real models), loosen the tolerance to ~1e-2.
    y = _conv3x3_ref_nchw(x, w1, b1)
    y = jnp.maximum(y * scale.reshape(1, C, 1, 1) + shift.reshape(1, C, 1, 1), 0.0)
    y = _conv3x3_ref_nchw(y, w2, b2)
    ref = x + y
    assert jnp.allclose(out, ref, atol=1e-4, rtol=1e-4), "mismatch vs JAX reference"

    print("KERNEL_OK")
</pallas_src>

<mosaic_0001>
module attributes {stable_mosaic.version = 11 : i64} {
  func.func @kernel(%arg0: i32, %arg1: memref<1x4x512xf32, #tpu.memory_space<vmem>>, %arg2: memref<4x36xf32, #tpu.memory_space<vmem>>, %arg3: memref<4x36xf32, #tpu.memory_space<vmem>>, %arg4: memref<4x1xf32, #tpu.memory_space<vmem>>, %arg5: memref<4x1xf32, #tpu.memory_space<vmem>>, %arg6: memref<4x1xf32, #tpu.memory_space<vmem>>, %arg7: memref<2x512xi32, #tpu.memory_space<vmem>>, %arg8: memref<36x2xi32, #tpu.memory_space<vmem>>, %arg9: memref<1x4x512xf32, #tpu.memory_space<vmem>>, %arg10: memref<36x512xf32, #tpu.memory_space<vmem>>) attributes {dimension_semantics = [#tpu.dimension_semantics<parallel>], iteration_bounds = array<i64: 1>, scalar_prefetch = 0 : i64, scratch_operands = 1 : i64, tpu.core_type = #tpu.core_type<tc>, window_params = [{transform_indices = @transform_0, window_bounds = array<i64: 1, 4, 512>}, {pipeline_mode = #tpu.pipeline_mode<synchronous>, transform_indices = @transform_1, window_bounds = array<i64: 4, 36>}, {pipeline_mode = #tpu.pipeline_mode<synchronous>, transform_indices = @transform_2, window_bounds = array<i64: 4, 36>}, {pipeline_mode = #tpu.pipeline_mode<synchronous>, transform_indices = @transform_3, window_bounds = array<i64: 4, 1>}, {pipeline_mode = #tpu.pipeline_mode<synchronous>, transform_indices = @transform_4, window_bounds = array<i64: 4, 1>}, {pipeline_mode = #tpu.pipeline_mode<synchronous>, transform_indices = @transform_5, window_bounds = array<i64: 4, 1>}, {pipeline_mode = #tpu.pipeline_mode<synchronous>, transform_indices = @transform_6, window_bounds = array<i64: 2, 512>}, {pipeline_mode = #tpu.pipeline_mode<synchronous>, transform_indices = @transform_7, window_bounds = array<i64: 36, 2>}, {transform_indices = @transform_8, window_bounds = array<i64: 1, 4, 512>}]} {
    %c0 = arith.constant 0 : index
    %c0_0 = arith.constant 0 : index
    %c0_1 = arith.constant 0 : index
    %0 = vector.load %arg1[%c0, %c0_0, %c0_1] : memref<1x4x512xf32, #tpu.memory_space<vmem>>, vector<1x4x512xf32>
    %1 = vector.shape_cast %0 : vector<1x4x512xf32> to vector<4x512xf32>
    %c0_2 = arith.constant 0 : index
    %c0_3 = arith.constant 0 : index
    %2 = vector.load %arg7[%c0_2, %c0_3] : memref<2x512xi32, #tpu.memory_space<vmem>>, vector<1x512xi32>
    %c1 = arith.constant 1 : index
    %c0_4 = arith.constant 0 : index
    %3 = vector.load %arg7[%c1, %c0_4] : memref<2x512xi32, #tpu.memory_space<vmem>>, vector<1x512xi32>
    %c0_5 = arith.constant 0 : index
    %c0_6 = arith.constant 0 : index
    %4 = vector.load %arg8[%c0_5, %c0_6] : memref<36x2xi32, #tpu.memory_space<vmem>>, vector<36x1xi32>
    %c0_7 = arith.constant 0 : index
    %c1_8 = arith.constant 1 : index
    %5 = vector.load %arg8[%c0_7, %c1_8] : memref<36x2xi32, #tpu.memory_space<vmem>>, vector<36x1xi32>
    %6 = vector.broadcast %2 : vector<1x512xi32> to vector<36x512xi32>
    %7 = vector.broadcast %4 : vector<36x1xi32> to vector<36x512xi32>
    %8 = arith.addi %6, %7 : vector<36x512xi32>
    %9 = vector.broadcast %3 : vector<1x512xi32> to vector<36x512xi32>
    %10 = vector.broadcast %5 : vector<36x1xi32> to vector<36x512xi32>
    %11 = arith.addi %9, %10 : vector<36x512xi32>
    %c0_i32 = arith.constant 0 : i32
    %12 = vector.broadcast %c0_i32 : i32 to vector<36x512xi32>
    %13 = arith.cmpi sge, %8, %12 : vector<36x512xi32>
    %c16_i32 = arith.constant 16 : i32
    %14 = vector.broadcast %c16_i32 : i32 to vector<36x512xi32>
    %15 = arith.cmpi slt, %8, %14 : vector<36x512xi32>
    %16 = arith.andi %13, %15 : vector<36x512xi1>
    %c0_i32_9 = arith.constant 0 : i32
    %17 = vector.broadcast %c0_i32_9 : i32 to vector<36x512xi32>
    %18 = arith.cmpi sge, %11, %17 : vector<36x512xi32>
    %19 = arith.andi %16, %18 : vector<36x512xi1>
    %c16_i32_10 = arith.constant 16 : i32
    %20 = vector.broadcast %c16_i32_10 : i32 to vector<36x512xi32>
    %21 = arith.cmpi slt, %11, %20 : vector<36x512xi32>
    %22 = arith.andi %19, %21 : vector<36x512xi1>
    %23 = arith.extui %22 : vector<36x512xi1> to vector<36x512xi32>
    %24 = arith.sitofp %23 : vector<36x512xi32> to vector<36x512xf32>
    %c0_11 = arith.constant 0 : index
    %c0_12 = arith.constant 0 : index
    %25 = vector.load %arg2[%c0_11, %c0_12] : memref<4x36xf32, #tpu.memory_space<vmem>>, vector<4x36xf32>
    %c17_i32 = arith.constant 17 : i32
    %26 = tpu.dynamic_rotate %1 by %c17_i32 dim 1 : vector<4x512xf32>, i32 -> vector<4x512xf32>
    %c0_13 = arith.constant 0 : index
    %c0_14 = arith.constant 0 : index
    %27 = vector.load %arg10[%c0_13, %c0_14] : memref<36x512xf32, #tpu.memory_space<vmem>>, vector<4x512xf32>
    tpu.vector_store %arg10[%c0_13, %c0_14], %26 {strides = array<i32>} : memref<36x512xf32, #tpu.memory_space<vmem>>, vector<4x512xf32>,
    %c16_i32_15 = arith.constant 16 : i32
    %28 = tpu.dynamic_rotate %1 by %c16_i32_15 dim 1 : vector<4x512xf32>, i32 -> vector<4x512xf32>
    %c4 = arith.constant 4 : index
    %c0_16 = arith.constant 0 : index
    %29 = vector.load %arg10[%c4, %c0_16] : memref<36x512xf32, #tpu.memory_space<vmem>>, vector<4x512xf32>
    tpu.vector_store %arg10[%c4, %c0_16], %28 {strides = array<i32>} : memref<36x512xf32, #tpu.memory_space<vmem>>, vector<4x512xf32>,
    %c15_i32 = arith.constant 15 : i32
    %30 = tpu.dynamic_rotate %1 by %c15_i32 dim 1 : vector<4x512xf32>, i32 -> vector<4x512xf32>
    %c8 = arith.constant 8 : index
    %c0_17 = arith.constant 0 : index
    %31 = vector.load %arg10[%c8, %c0_17] : memref<36x512xf32, #tpu.memory_space<vmem>>, vector<4x512xf32>
    tpu.vector_store %arg10[%c8, %c0_17], %30 {strides = array<i32>} : memref<36x512xf32, #tpu.memory_space<vmem>>, vector<4x512xf32>,
    %c1_i32 = arith.constant 1 : i32
    %32 = tpu.dynamic_rotate %1 by %c1_i32 dim 1 : vector<4x512xf32>, i32 -> vector<4x512xf32>
    %c12 = arith.constant 12 : index
    %c0_18 = arith.constant 0 : index
    %33 = vector.load %arg10[%c12, %c0_18] : memref<36x512xf32, #tpu.memory_space<vmem>>, vector<4x512xf32>
    tpu.vector_store %arg10[%c12, %c0_18], %32 {strides = array<i32>} : memref<36x512xf32, #tpu.memory_space<vmem>>, vector<4x512xf32>,
    %c16 = arith.constant 16 : index
    %c0_19 = arith.constant 0 : index
    %34 = vector.load %arg10[%c16, %c0_19] : memref<36x512xf32, #tpu.memory_space<vmem>>, vector<4x512xf32>
    tpu.vector_store %arg10[%c16, %c0_19], %1 {strides = array<i32>} : memref<36x512xf32, #tpu.memory_space<vmem>>, vector<4x512xf32>,
    %c511_i32 = arith.constant 511 : i32
    %35 = tpu.dynamic_rotate %1 by %c511_i32 dim 1 : vector<4x512xf32>, i32 -> vector<4x512xf32>
    %c20 = arith.constant 20 : index
    %c0_20 = arith.constant 0 : index
    %36 = vector.load %arg10[%c20, %c0_20] : memref<36x512xf32, #tpu.memory_space<vmem>>, vector<4x512xf32>
    tpu.vector_store %arg10[%c20, %c0_20], %35 {strides = array<i32>} : memref<36x512xf32, #tpu.memory_space<vmem>>, vector<4x512xf32>,
    %c497_i32 = arith.constant 497 : i32
    %37 = tpu.dynamic_rotate %1 by %c497_i32 dim 1 : vector<4x512xf32>, i32 -> vector<4x512xf32>
    %c24 = arith.constant 24 : index
    %c0_21 = arith.constant 0 : index
    %38 = vector.load %arg10[%c24, %c0_21] : memref<36x512xf32, #tpu.memory_space<vmem>>, vector<4x512xf32>
    tpu.vector_store %arg10[%c24, %c0_21], %37 {strides = array<i32>} : memref<36x512xf32, #tpu.memory_space<vmem>>, vector<4x512xf32>,
    %c496_i32 = arith.constant 496 : i32
    %39 = tpu.dynamic_rotate %1 by %c496_i32 dim 1 : vector<4x512xf32>, i32 -> vector<4x512xf32>
    %c28 = arith.constant 28 : index
    %c0_22 = arith.constant 0 : index
    %40 = vector.load %arg10[%c28, %c0_22] : memref<36x512xf32, #tpu.memory_space<vmem>>, vector<4x512xf32>
    tpu.vector_store %arg10[%c28, %c0_22], %39 {strides = array<i32>} : memref<36x512xf32, #tpu.memory_space<vmem>>, vector<4x512xf32>,
    %c495_i32 = arith.constant 495 : i32
    %41 = tpu.dynamic_rotate %1 by %c495_i32 dim 1 : vector<4x512xf32>, i32 -> vector<4x512xf32>
    %c32 = arith.constant 32 : index
    %c0_23 = arith.constant 0 : index
    %42 = vector.load %arg10[%c32, %c0_23] : memref<36x512xf32, #tpu.memory_space<vmem>>, vector<4x512xf32>
    tpu.vector_store %arg10[%c32, %c0_23], %41 {strides = array<i32>} : memref<36x512xf32, #tpu.memory_space<vmem>>, vector<4x512xf32>,
    %c0_24 = arith.constant 0 : index
    %c0_25 = arith.constant 0 : index
    %43 = vector.load %arg10[%c0_24, %c0_25] : memref<36x512xf32, #tpu.memory_space<vmem>>, vector<36x512xf32>
    %44 = arith.mulf %43, %24 : vector<36x512xf32>
    %cst = arith.constant dense<0.000000e+00> : vector<4x512xf32>
    %45 = tpu.matmul %25, %44, %cst {dimension_numbers = #tpu.dot_dimension_numbers<[1], [0], [0], [1], [0, 0, 1, 1], [], []>} : vector<4x36xf32>, vector<36x512xf32>, vector<4x512xf32> -> vector<4x512xf32>
    %c0_26 = arith.constant 0 : index
    %c0_27 = arith.constant 0 : index
    %46 = vector.load %arg4[%c0_26, %c0_27] : memref<4x1xf32, #tpu.memory_space<vmem>>, vector<4x1xf32>
    %47 = vector.broadcast %46 : vector<4x1xf32> to vector<4x512xf32>
    %48 = arith.mulf %45, %47 : vector<4x512xf32>
    %c0_28 = arith.constant 0 : index
    %c0_29 = arith.constant 0 : index
    %49 = vector.load %arg5[%c0_28, %c0_29] : memref<4x1xf32, #tpu.memory_space<vmem>>, vector<4x1xf32>
    %50 = vector.broadcast %49 : vector<4x1xf32> to vector<4x512xf32>
    %51 = arith.addf %48, %50 : vector<4x512xf32>
    %cst_30 = arith.constant 0.000000e+00 : f32
    %52 = vector.broadcast %cst_30 : f32 to vector<4x512xf32>
    %53 = arith.maximumf %51, %52 : vector<4x512xf32>
    %c0_31 = arith.constant 0 : index
    %c0_32 = arith.constant 0 : index
    %54 = vector.load %arg3[%c0_31, %c0_32] : memref<4x36xf32, #tpu.memory_space<vmem>>, vector<4x36xf32>
    %c17_i32_33 = arith.constant 17 : i32
    %55 = tpu.dynamic_rotate %53 by %c17_i32_33 dim 1 : vector<4x512xf32>, i32 -> vector<4x512xf32>
    %c0_34 = arith.constant 0 : index
    %c0_35 = arith.constant 0 : index
    %56 = vector.load %arg10[%c0_34, %c0_35] : memref<36x512xf32, #tpu.memory_space<vmem>>, vector<4x512xf32>
    tpu.vector_store %arg10[%c0_34, %c0_35], %55 {strides = array<i32>} : memref<36x512xf32, #tpu.memory_space<vmem>>, vector<4x512xf32>,
    %c16_i32_36 = arith.constant 16 : i32
    %57 = tpu.dynamic_rotate %53 by %c16_i32_36 dim 1 : vector<4x512xf32>, i32 -> vector<4x512xf32>
    %c4_37 = arith.constant 4 : index
    %c0_38 = arith.constant 0 : index
    %58 = vector.load %arg10[%c4_37, %c0_38] : memref<36x512xf32, #tpu.memory_space<vmem>>, vector<4x512xf32>
    tpu.vector_store %arg10[%c4_37, %c0_38], %57 {strides = array<i32>} : memref<36x512xf32, #tpu.memory_space<vmem>>, vector<4x512xf32>,
    %c15_i32_39 = arith.constant 15 : i32
    %59 = tpu.dynamic_rotate %53 by %c15_i32_39 dim 1 : vector<4x512xf32>, i32 -> vector<4x512xf32>
    %c8_40 = arith.constant 8 : index
    %c0_41 = arith.constant 0 : index
    %60 = vector.load %arg10[%c8_40, %c0_41] : memref<36x512xf32, #tpu.memory_space<vmem>>, vector<4x512xf32>
    tpu.vector_store %arg10[%c8_40, %c0_41], %59 {strides = array<i32>} : memref<36x512xf32, #tpu.memory_space<vmem>>, vector<4x512xf32>,
    %c1_i32_42 = arith.constant 1 : i32
    %61 = tpu.dynamic_rotate %53 by %c1_i32_42 dim 1 : vector<4x512xf32>, i32 -> vector<4x512xf32>
    %c12_43 = arith.constant 12 : index
    %c0_44 = arith.constant 0 : index
    %62 = vector.load %arg10[%c12_43, %c0_44] : memref<36x512xf32, #tpu.memory_space<vmem>>, vector<4x512xf32>
    tpu.vector_store %arg10[%c12_43, %c0_44], %61 {strides = array<i32>} : memref<36x512xf32, #tpu.memory_space<vmem>>, vector<4x512xf32>,
    %c16_45 = arith.constant 16 : index
    %c0_46 = arith.constant 0 : index
    %63 = vector.load %arg10[%c16_45, %c0_46] : memref<36x512xf32, #tpu.memory_space<vmem>>, vector<4x512xf32>
    tpu.vector_store %arg10[%c16_45, %c0_46], %53 {strides = array<i32>} : memref<36x512xf32, #tpu.memory_space<vmem>>, vector<4x512xf32>,
    %c511_i32_47 = arith.constant 511 : i32
    %64 = tpu.dynamic_rotate %53 by %c511_i32_47 dim 1 : vector<4x512xf32>, i32 -> vector<4x512xf32>
    %c20_48 = arith.constant 20 : index
    %c0_49 = arith.constant 0 : index
    %65 = vector.load %arg10[%c20_48, %c0_49] : memref<36x512xf32, #tpu.memory_space<vmem>>, vector<4x512xf32>
    tpu.vector_store %arg10[%c20_48, %c0_49], %64 {strides = array<i32>} : memref<36x512xf32, #tpu.memory_space<vmem>>, vector<4x512xf32>,
    %c497_i32_50 = arith.constant 497 : i32
    %66 = tpu.dynamic_rotate %53 by %c497_i32_50 dim 1 : vector<4x512xf32>, i32 -> vector<4x512xf32>
    %c24_51 = arith.constant 24 : index
    %c0_52 = arith.constant 0 : index
    %67 = vector.load %arg10[%c24_51, %c0_52] : memref<36x512xf32, #tpu.memory_space<vmem>>, vector<4x512xf32>
    tpu.vector_store %arg10[%c24_51, %c0_52], %66 {strides = array<i32>} : memref<36x512xf32, #tpu.memory_space<vmem>>, vector<4x512xf32>,
    %c496_i32_53 = arith.constant 496 : i32
    %68 = tpu.dynamic_rotate %53 by %c496_i32_53 dim 1 : vector<4x512xf32>, i32 -> vector<4x512xf32>
    %c28_54 = arith.constant 28 : index
    %c0_55 = arith.constant 0 : index
    %69 = vector.load %arg10[%c28_54, %c0_55] : memref<36x512xf32, #tpu.memory_space<vmem>>, vector<4x512xf32>
    tpu.vector_store %arg10[%c28_54, %c0_55], %68 {strides = array<i32>} : memref<36x512xf32, #tpu.memory_space<vmem>>, vector<4x512xf32>,
    %c495_i32_56 = arith.constant 495 : i32
    %70 = tpu.dynamic_rotate %53 by %c495_i32_56 dim 1 : vector<4x512xf32>, i32 -> vector<4x512xf32>
    %c32_57 = arith.constant 32 : index
    %c0_58 = arith.constant 0 : index
    %71 = vector.load %arg10[%c32_57, %c0_58] : memref<36x512xf32, #tpu.memory_space<vmem>>, vector<4x512xf32>
    tpu.vector_store %arg10[%c32_57, %c0_58], %70 {strides = array<i32>} : memref<36x512xf32, #tpu.memory_space<vmem>>, vector<4x512xf32>,
    %c0_59 = arith.constant 0 : index
    %c0_60 = arith.constant 0 : index
    %72 = vector.load %arg10[%c0_59, %c0_60] : memref<36x512xf32, #tpu.memory_space<vmem>>, vector<36x512xf32>
    %73 = arith.mulf %72, %24 : vector<36x512xf32>
    %cst_61 = arith.constant dense<0.000000e+00> : vector<4x512xf32>
    %74 = tpu.matmul %54, %73, %cst_61 {dimension_numbers = #tpu.dot_dimension_numbers<[1], [0], [0], [1], [0, 0, 1, 1], [], []>} : vector<4x36xf32>, vector<36x512xf32>, vector<4x512xf32> -> vector<4x512xf32>
    %75 = arith.addf %1, %74 : vector<4x512xf32>
    %c0_62 = arith.constant 0 : index
    %c0_63 = arith.constant 0 : index
    %76 = vector.load %arg6[%c0_62, %c0_63] : memref<4x1xf32, #tpu.memory_space<vmem>>, vector<4x1xf32>
    %77 = vector.broadcast %76 : vector<4x1xf32> to vector<4x512xf32>
    %78 = arith.addf %75, %77 : vector<4x512xf32>
    %c0_64 = arith.constant 0 : index
    %c0_65 = arith.constant 0 : index
    %c0_66 = arith.constant 0 : index
    %79 = vector.load %arg9[%c0_64, %c0_65, %c0_66] : memref<1x4x512xf32, #tpu.memory_space<vmem>>, vector<1x4x512xf32>
    %80 = vector.shape_cast %79 : vector<1x4x512xf32> to vector<4x512xf32>
    %81 = vector.shape_cast %78 : vector<4x512xf32> to vector<1x4x512xf32>
    tpu.vector_store %arg9[%c0_64, %c0_65, %c0_66], %81 {strides = array<i32>} : memref<1x4x512xf32, #tpu.memory_space<vmem>>, vector<1x4x512xf32>,
    return
  }
  func.func @transform_0(%arg0: i32) -> (i32, i32, i32) {
    %c0_i32 = arith.constant 0 : i32
    %c0_i32_0 = arith.constant 0 : i32
    %c0_i32_1 = arith.constant 0 : i32
    return %arg0, %c0_i32, %c0_i32_0 : i32, i32, i32
  }
  func.func @transform_1(%arg0: i32) -> (i32, i32) {
    %c0_i32 = arith.constant 0 : i32
    %c0_i32_0 = arith.constant 0 : i32
    %c0_i32_1 = arith.constant 0 : i32
    return %c0_i32, %c0_i32_0 : i32, i32
  }
  func.func @transform_2(%arg0: i32) -> (i32, i32) {
    %c0_i32 = arith.constant 0 : i32
    %c0_i32_0 = arith.constant 0 : i32
    %c0_i32_1 = arith.constant 0 : i32
    return %c0_i32, %c0_i32_0 : i32, i32
  }
  func.func @transform_3(%arg0: i32) -> (i32, i32) {
    %c0_i32 = arith.constant 0 : i32
    %c0_i32_0 = arith.constant 0 : i32
    %c0_i32_1 = arith.constant 0 : i32
    return %c0_i32, %c0_i32_0 : i32, i32
  }
  func.func @transform_4(%arg0: i32) -> (i32, i32) {
    %c0_i32 = arith.constant 0 : i32
    %c0_i32_0 = arith.constant 0 : i32
    %c0_i32_1 = arith.constant 0 : i32
    return %c0_i32, %c0_i32_0 : i32, i32
  }
  func.func @transform_5(%arg0: i32) -> (i32, i32) {
    %c0_i32 = arith.constant 0 : i32
    %c0_i32_0 = arith.constant 0 : i32
    %c0_i32_1 = arith.constant 0 : i32
    return %c0_i32, %c0_i32_0 : i32, i32
  }
  func.func @transform_6(%arg0: i32) -> (i32, i32) {
    %c0_i32 = arith.constant 0 : i32
    %c0_i32_0 = arith.constant 0 : i32
    %c0_i32_1 = arith.constant 0 : i32
    return %c0_i32, %c0_i32_0 : i32, i32
  }
  func.func @transform_7(%arg0: i32) -> (i32, i32) {
    %c0_i32 = arith.constant 0 : i32
    %c0_i32_0 = arith.constant 0 : i32
    %c0_i32_1 = arith.constant 0 : i32
    return %c0_i32, %c0_i32_0 : i32, i32
  }
  func.func @transform_8(%arg0: i32) -> (i32, i32, i32) {
    %c0_i32 = arith.constant 0 : i32
    %c0_i32_0 = arith.constant 0 : i32
    %c0_i32_1 = arith.constant 0 : i32
    return %arg0, %c0_i32, %c0_i32_0 : i32, i32, i32
  }
}

</mosaic_0001>

<bundles_post_ra>
// kernel: tile.22
= control target key start
LH: loop header
LB: loop body
LE: loop exit
PB: predicated region body
PF: predicated region fallthrough
CT: control target
= control target key end

     0   :  { %s7_s6 = smov 3  ;;  %s21_s9 = smov 3  ;;  %vm4_vm0 = vcmask 130048   ;;  %vm11_vm1 = vcmask 1048448   ;;  %vm18_vm2 = vcmask 917248   ;;  %vm25_vm3 = vcmask 786048   ;;  %s119_s0 = inlined_call_operand.vmem [shape: s32[16,16], index: 0, kind: input, shape index: {}]   ;;  %s120_s1 = inlined_call_operand.vmem [shape: s32[256], index: 1, kind: output, shape index: {}]  }
   0x1   :  { %v61_v0 = vld [vmem:[%s119_s0 + $0x7] ss:$8 sm:%s7_s6]   ;;  %s75_s10 = smov 112   ;;  %v63_v1 = vld [vmem:[%s119_s0 + $0x5] ss:$8 sm:%s21_s9]   ;;  %s76_s13 = smov 80  }
   0x2   :  { %9 = vrot.lane.b32.xlu0 %v61_v0, %s75_s10  ;;  %23 = vrot.lane.b32.xlu1 %v63_v1, %s76_s13  ;;  %s14_s14 = smov 3  ;;  %s28_s15 = smov 3  ;;  %vm32_vm4 = vcmask 654848   ;;  %vm39_vm5 = vcmask 523648   ;;  %vm46_vm6 = vcmask 392448   ;;  %vm53_vm7 = vcmask 261248  }
   0x3   :  { %s35_s16 = smov 3  ;;  %v62_v3 = vld [vmem:[%s119_s0 + $0x6] ss:$8 sm:%s14_s14]   ;;  %s77_s21 = smov 48   ;;  %v64_v4 = vld [vmem:[%s119_s0 + $0x4] ss:$8 sm:%s28_s15]  }
   0x4   :  { %v65_v2 = vld [vmem:[%s119_s0 + $0x3] ss:$8 sm:%s35_s16]   ;;  %s42_s24 = smov 3  ;;  %s78_s25 = smov 96  }
   0x5   :  { %37 = vrot.lane.b32.xlu2 %v65_v2, %s77_s21  ;;  %s79_s26 = smov 64   ;;  %s49_s27 = smov 3  ;;  %v66_v5 = vld [vmem:[%s119_s0 + $0x2] ss:$8 sm:%s42_s24]  }
   0x6   :  { %v67_v6 = vld [vmem:[%s119_s0 + $0x1] ss:$8 sm:%s49_s27]   ;;  %s80_s3 = smov 32   ;;  %s81_s4 = smov 16  }
   0x7   :  { %s2_s5 = smov 3 }
   0x8   :  { %v3_v7 = vld [vmem:[%s119_s0] ss:$8 sm:%s2_s5]  }
   0x9   :  { %5 = vst.msk [vmem:[#allocation0] sm:$0x3] %vm4_vm0, %v3_v7  }
   0xa   :  { %16 = vrot.lane.b32.xlu0 %v62_v3, %s78_s25  ;;  %30 = vrot.lane.b32.xlu1 %v64_v4, %s79_s26 }
   0xd   :  { %44 = vrot.lane.b32.xlu2 %v66_v5, %s80_s3 }
  0x12   :  { %51 = vrot.lane.b32.xlu0 %v67_v6, %s81_s4 }
  0x5f   :  { %v38_v8 = vpop.permute.xlu2 %37  }
  0x67   :  { %v45_v9 = vpop.permute.xlu2 %44  }
  0x74   :  { %v10_v10 = vpop.permute.xlu0 %9   ;;  %v24_v11 = vpop.permute.xlu1 %23  }
  0x75   :  { %12 = vst.msk [vmem:[#allocation0] sm:$0x3] %vm11_vm1, %v10_v10  }
  0x7c   :  { %v17_v12 = vpop.permute.xlu0 %16   ;;  %v31_v13 = vpop.permute.xlu1 %30  }
  0x7d   :  { %19 = vst.msk [vmem:[#allocation0] sm:$0x3] %vm18_vm2, %v17_v12  }
  0x7e   :  { %26 = vst.msk [vmem:[#allocation0] sm:$0x3] %vm25_vm3, %v24_v11  }
  0x7f   :  { %33 = vst.msk [vmem:[#allocation0] sm:$0x3] %vm32_vm4, %v31_v13  }
  0x80   :  { %40 = vst.msk [vmem:[#allocation0] sm:$0x3] %vm39_vm5, %v38_v8  }
  0x81   :  { %47 = vst.msk [vmem:[#allocation0] sm:$0x3] %vm46_vm6, %v45_v9  }
  0x84   :  { %v52_v14 = vpop.permute.xlu0 %51  }
  0x85   :  { %54 = vst.msk [vmem:[#allocation0] sm:$0x3] %vm53_vm7, %v52_v14  }
  0x8c   :  { %v57_v15 = vld [vmem:[#allocation0] sm:$0x3] }
  0x8d   :  { %60 = vst [vmem:[%s120_s1] sm:$0x3] %v57_v15 }

// kernel: br_forward.1
= control target key start
LH: loop header
LB: loop body
LE: loop exit
PB: predicated region body
PF: predicated region fallthrough
CT: control target
= control target key end

     0   :  { %v1155_v0 = vmov 0   ;;  %v1156_v6 = vmov 1   ;;  %s1158_s15 = smov 15   ;;  %s1159_s16 = smov 1   ;;  %v319_v59 = vlaneseq  ;;  %s2020_s7 = inlined_call_operand.vmem [shape: s32[36,2], index: 7, kind: input, shape index: {}]   ;;  %s2021_s0 = inlined_call_operand.vmem [shape: f32[1,4,512], index: 0, kind: input, shape index: {}, may-alias: {0,8}]   ;;  %s2022_s6 = inlined_call_operand.vmem [shape: s32[2,512], index: 6, kind: input, shape index: {}]   ;;  %s2023_s3 = inlined_call_operand.vmem [shape: f32[4,1], index: 3, kind: input, shape index: {}]   ;;  %s2024_s4 = inlined_call_operand.vmem [shape: f32[4,1], index: 4, kind: input, shape index: {}]   ;;  %s2025_s1 = inlined_call_operand.vmem [shape: f32[4,36], index: 1, kind: input, shape index: {}]   ;;  %s2026_s5 = inlined_call_operand.vmem [shape: f32[4,1], index: 5, kind: input, shape index: {}]   ;;  %s2027_s2 = inlined_call_operand.vmem [shape: f32[4,36], index: 2, kind: input, shape index: {}]   ;;  %s2028_s8 = inlined_call_operand.vmem [shape: f32[1,4,512], index: 8, kind: output, shape index: {}, may-alias: {0,8}]  }
   0x1   :  { %1145 = vset.pattern.permute.xlu2 %v1155_v0  ;;  %v38_v1 = vld [vmem:[%s2020_s7 + $0x20] sm:$0xf]  ;;  %1148 = vset.pattern.permute.xlu1 %v1155_v0  ;;  %v36_v2 = vld [vmem:[%s2020_s7 + $0x10] sm:$0xff]  ;;  %v1223_v3 = vld [vmem:[%s2021_s0 + $0x8] sm:$0xff]  ;;  %s1160_s17 = smov 127   ;;  %s1161_s18 = smov 113  }
   0x2   :  { %56 = vperm.xlu2 %1145, %v38_v1   ;;  %50 = vperm.xlu1 %1148, %v36_v2   ;;  %302 = vst [vmem:[#allocation1 + $0x10] ss:$2 sm:$0xff] %v1223_v3  ;;  %v1229_v4 = vld [vmem:[%s2020_s7 + $0x18] sm:$0xff]  ;;  %v1234_v5 = vld [vmem:[%s2021_s0] sm:$0xff]  ;;  %s1157_s0 = smov 16   ;;  %s1162_s19 = smov 112  }
   0x3   :  { %1147 = vset.pattern.permute.xlu0 %v1156_v6  ;;  %300 = vst [vmem:[#allocation1] ss:$2 sm:$0xff] %v1234_v5  ;;  %s1163_s20 = smov 111   ;;  %v35_v40 = vld [vmem:[%s2020_s7 + $0x8] sm:$0xff]  ;;  %s1164_s23 = smov 17   ;;  %v34_v49 = vld [vmem:[%s2020_s7] sm:$0xff] }
   0x4   :  { %92 = vperm.xlu0 %1147, %v1229_v4   ;;  %v1096_v46 = vld [vmem:[%s2022_s6 + $0x1] ss:$2 sm:$0xf]  ;;  %v31_v48 = vld [vmem:[%s2022_s6] ss:$2 sm:$0xf] }
   0x5   :  { %v1324_v50 = vperm.slane %v1096_v46, 3  ;;  %v1326_v51 = vperm.slane %v31_v48, 3  ;;  %v1328_v52 = vperm.slane %v1096_v46, 2  ;;  %v1332_v53 = vperm.slane %v31_v48, 2 }
   0x6   :  { %v1335_v55 = vperm.slane %v1096_v46, 0  ;;  %v1341_v60 = vperm.slane %v31_v48, 0  ;;  %v1344_v62 = vperm.slane %v31_v48, 1  ;;  %v1346_v63 = vperm.slane %v1096_v46, 1 }
   0x9   :  { %v1239_v7 = vld.sshfl [vmem:[#allocation1 + $0x10] sm:$0xff pattern:$0x75316420]  ;;  %v1241_v8 = vld.sshfl [vmem:[#allocation1 + $0x18] sm:$0xff pattern:$0x75316420] }
   0xa   :  { %1146 = vset.pattern.permute.xlu2 %v1156_v6  ;;  %332 = vst [vmem:[#allocation1 + $0x10] ss:$2 sm:$0xff] %v1223_v3  ;;  %v1245_v9 = vld.sshfl [vmem:[#allocation1] sm:$0xff pattern:$0x75316420]  ;;  %1149 = vset.pattern.permute.xlu1 %v1156_v6 }
   0xb   :  { %95 = vperm.xlu2 %1146, %v38_v1   ;;  %v1248_v10 = vld.sshfl [vmem:[#allocation1 + $0x8] sm:$0xff pattern:$0x75316420]  ;;  %v726_v1 = vld [vmem:[%s2023_s3] sm:$0xf] }
   0xc   :  { %330 = vst [vmem:[#allocation1] ss:$2 sm:$0xff] %v1234_v5 }
  0x11   :  { %v336_v11 = vld.sshfl [vmem:[#allocation1 + $0x18] sm:$0xff pattern:$0x75316420]  ;;  %v335_v12 = vld.sshfl [vmem:[#allocation1 + $0x10] sm:$0xff pattern:$0x75316420] }
  0x12   :  { %347 = vrot.lane.b32.xlu1 %v336_v11, %s1157_s0  ;;  %372 = vst [vmem:[#allocation1 + $0x10] ss:$2 sm:$0xff] %v1223_v3 }
  0x13   :  { %345 = vrot.lane.b32.xlu2 %v335_v12, %s1157_s0  ;;  %v1254_v13 = vld.sshfl [vmem:[#allocation1] sm:$0xff pattern:$0x75316420]  ;;  %v1256_v14 = vld.sshfl [vmem:[#allocation1 + $0x8] sm:$0xff pattern:$0x75316420] }
  0x14   :  { %370 = vst [vmem:[#allocation1] ss:$2 sm:$0xff] %v1234_v5  ;;  %1150 = vset.pattern.permute.xlu2 %v1155_v0 }
  0x19   :  { %v375_v15 = vld.sshfl [vmem:[#allocation1 + $0x10] sm:$0xff pattern:$0x75316420]  ;;  %v376_v16 = vld.sshfl [vmem:[#allocation1 + $0x18] sm:$0xff pattern:$0x75316420] }
  0x1a   :  { %400 = vst [vmem:[#allocation1 + $0x10] ss:$2 sm:$0xff] %v1223_v3  ;;  %387 = vrot.lane.b32.xlu0 %v376_v16, %s1158_s15 }
  0x1b   :  { %385 = vrot.lane.b32.xlu2 %v375_v15, %s1158_s15  ;;  %v1263_v17 = vld.sshfl [vmem:[#allocation1] sm:$0xff pattern:$0x75316420]  ;;  %v1265_v18 = vld.sshfl [vmem:[#allocation1 + $0x8] sm:$0xff pattern:$0x75316420] }
  0x1c   :  { %398 = vst [vmem:[#allocation1] ss:$2 sm:$0xff] %v1234_v5 }
  0x21   :  { %v403_v19 = vld.sshfl [vmem:[#allocation1 + $0x10] sm:$0xff pattern:$0x75316420]  ;;  %v404_v20 = vld.sshfl [vmem:[#allocation1 + $0x18] sm:$0xff pattern:$0x75316420] }
  0x22   :  { %413 = vrot.lane.b32.xlu1 %v403_v19, %s1159_s16  ;;  %440 = vst [vmem:[#allocation1 + $0x10] ss:$2 sm:$0xff] %v1223_v3 }
  0x23   :  { %415 = vrot.lane.b32.xlu2 %v404_v20, %s1159_s16  ;;  %v402_v21 = vld.sshfl [vmem:[#allocation1 + $0x8] sm:$0xff pattern:$0x75316420]  ;;  %v1271_v22 = vld.sshfl [vmem:[#allocation1] sm:$0xff pattern:$0x75316420] }
  0x24   :  { %438 = vst [vmem:[#allocation1] ss:$2 sm:$0xff] %v1234_v5  ;;  %v2044_v20 = vmov 0 }
  0x29   :  { %v443_v23 = vld.sshfl [vmem:[#allocation1 + $0x10] sm:$0xff pattern:$0x75316420]  ;;  %v444_v24 = vld.sshfl [vmem:[#allocation1 + $0x18] sm:$0xff pattern:$0x75316420] }
  0x2a   :  { %451 = vst [vmem:[#allocation2 + $0x28] sm:$0xf] %v443_v23  ;;  %411 = vrot.lane.b32.xlu1 %v402_v21, %s1159_s16 }
  0x2b   :  { %452 = vst [vmem:[#allocation2 + $0x40] sm:$0xf] %v444_v24  ;;  %v441_v25 = vld.sshfl [vmem:[#allocation1] sm:$0xff pattern:$0x75316420] }
  0x2c   :  { %455 = vst [vmem:[#allocation1 + $0x10] ss:$2 sm:$0xff] %v1223_v3  ;;  %v442_v26 = vld.sshfl [vmem:[#allocation1 + $0x8] sm:$0xff pattern:$0x75316420] }
  0x2d   :  { %449 = vst [vmem:[#allocation2 + $0x8] sm:$0xf] %v441_v25 }
  0x2e   :  { %450 = vst [vmem:[#allocation2 + $0x88] sm:$0xf] %v442_v26 }
  0x2f   :  { %453 = vst [vmem:[#allocation1] ss:$2 sm:$0xff] %v1234_v5 }
  0x32   :  { %89 = vperm.xlu1 %1149, %v36_v2  }
  0x33   :  { %v459_v27 = vld.sshfl [vmem:[#allocation1 + $0x18] sm:$0xff pattern:$0x75316420]  ;;  %v458_v28 = vld.sshfl [vmem:[#allocation1 + $0x10] sm:$0xff pattern:$0x75316420] }
  0x34   :  { %470 = vrot.lane.b32.xlu0 %v459_v27, %s1160_s17  ;;  %495 = vst [vmem:[#allocation1 + $0x10] ss:$2 sm:$0xff] %v1223_v3 }
  0x36   :  { %v456_v29 = vld.sshfl [vmem:[#allocation1] sm:$0xff pattern:$0x75316420]  ;;  %v457_v30 = vld.sshfl [vmem:[#allocation1 + $0x8] sm:$0xff pattern:$0x75316420] }
  0x37   :  { %464 = vrot.lane.b32.xlu2 %v456_v29, %s1160_s17  ;;  %493 = vst [vmem:[#allocation1] ss:$2 sm:$0xff] %v1234_v5 }
  0x3a   :  { %468 = vrot.lane.b32.xlu1 %v458_v28, %s1160_s17 }
  0x3b   :  { %v499_v31 = vld.sshfl [vmem:[#allocation1 + $0x18] sm:$0xff pattern:$0x75316420]  ;;  %v498_v32 = vld.sshfl [vmem:[#allocation1 + $0x10] sm:$0xff pattern:$0x75316420]  ;;  %1152 = vset.pattern.permute.xlu1 %v1155_v0 }
  0x3c   :  { %523 = vst [vmem:[#allocation1 + $0x10] ss:$2 sm:$0xff] %v1223_v3 }
  0x3e   :  { %v496_v33 = vld.sshfl [vmem:[#allocation1] sm:$0xff pattern:$0x75316420]  ;;  %v497_v34 = vld.sshfl [vmem:[#allocation1 + $0x8] sm:$0xff pattern:$0x75316420] }
  0x3f   :  { %510 = vrot.lane.b32.xlu2 %v499_v31, %s1161_s18  ;;  %521 = vst [vmem:[#allocation1] ss:$2 sm:$0xff] %v1234_v5 }
  0x42   :  { %504 = vrot.lane.b32.xlu1 %v496_v33, %s1161_s18 }
  0x43   :  { %v527_v35 = vld.sshfl [vmem:[#allocation1 + $0x18] sm:$0xff pattern:$0x75316420]  ;;  %v526_v36 = vld.sshfl [vmem:[#allocation1 + $0x10] sm:$0xff pattern:$0x75316420] }
  0x44   :  { %563 = vst [vmem:[#allocation1 + $0x10] ss:$2 sm:$0xff] %v1223_v3 }
  0x46   :  { %v524_v37 = vld.sshfl [vmem:[#allocation1] sm:$0xff pattern:$0x75316420]  ;;  %v525_v38 = vld.sshfl [vmem:[#allocation1 + $0x8] sm:$0xff pattern:$0x75316420] }
  0x47   :  { %508 = vrot.lane.b32.xlu2 %v498_v32, %s1161_s18  ;;  %532 = vrot.lane.b32.xlu0 %v524_v37, %s1162_s19  ;;  %561 = vst [vmem:[#allocation1] ss:$2 sm:$0xff] %v1234_v5 }
  0x4b   :  { %v567_v41 = vld.sshfl [vmem:[#allocation1 + $0x18] sm:$0xff pattern:$0x75316420]  ;;  %v566_v42 = vld.sshfl [vmem:[#allocation1 + $0x10] sm:$0xff pattern:$0x75316420] }
  0x4e   :  { %v564_v39 = vld.sshfl [vmem:[#allocation1] sm:$0xff pattern:$0x75316420]  ;;  %v565_v45 = vld.sshfl [vmem:[#allocation1 + $0x8] sm:$0xff pattern:$0x75316420] }
  0x4f   :  { %534 = vrot.lane.b32.xlu2 %v525_v38, %s1162_s19  ;;  %538 = vrot.lane.b32.xlu0 %v527_v35, %s1162_s19 }
  0x50   :  { %572 = vrot.lane.b32.xlu1 %v564_v39, %s1163_s20 }
  0x57   :  { %47 = vperm.xlu2 %1150, %v35_v40   ;;  %536 = vrot.lane.b32.xlu0 %v526_v36, %s1162_s19 }
  0x58   :  { %578 = vrot.lane.b32.xlu1 %v567_v41, %s1163_s20 }
  0x5c   :  { %v57_v43 = vpop.permute.xlu2 %56 }
  0x5d   :  { %v77_v54 = vadd.s32 %v57_v43, %v1326_v51  ;;  %v76_v56 = vadd.s32 %v57_v43, %v1332_v53  ;;  %v74_v2 = vadd.s32 %v57_v43, %v1341_v60  ;;  %v75_v11 = vadd.s32 %v57_v43, %v1344_v62 }
  0x5f   :  { %343 = vrot.lane.b32.xlu2 %v1256_v14, %s1157_s0  ;;  %315 = vrot.lane.b32.xlu0 %v1239_v7, %s1164_s23  ;;  %vm136_vm0 = vcmp.ge.s32.totalorder %v77_v54, 0  ;;  %vm156_vm1 = vcmp.lt.s32.totalorder %v77_v54, 16  ;;  %vm135_vm4 = vcmp.ge.s32.totalorder %v76_v56, 0  ;;  %vm155_vm5 = vcmp.lt.s32.totalorder %v76_v56, 16 }
  0x60   :  { %576 = vrot.lane.b32.xlu1 %v566_v42, %s1163_s20  ;;  %vm176_vm2 = vmand %vm136_vm0, %vm156_vm1  ;;  %vm133_vm12 = vcmp.ge.s32.totalorder %v74_v2, 0  ;;  %vm153_vm13 = vcmp.lt.s32.totalorder %v74_v2, 16  ;;  %v2056_v54 = vmov 0 }
  0x61   :  { %vm175_vm11 = vmand %vm135_vm4, %vm155_vm5 }
  0x65   :  { %v96_v44 = vpop.permute.xlu2 %95 }
  0x66   :  { %v116_v57 = vadd.s32 %v96_v44, %v1324_v50  ;;  %v115_v61 = vadd.s32 %v96_v44, %v1328_v52  ;;  %v113_v7 = vadd.s32 %v96_v44, %v1335_v55 }
  0x67   :  { %506 = vrot.lane.b32.xlu2 %v497_v34, %s1161_s18  ;;  %383 = vrot.lane.b32.xlu0 %v1265_v18, %s1158_s15  ;;  %v2042_v18 = vmov 0 }
  0x68   :  { %317 = vrot.lane.b32.xlu1 %v1241_v8, %s1164_s23  ;;  %vm196_vm3 = vcmp.ge.s32.totalorder %v116_v57, 0  ;;  %vm236_vm7 = vcmp.lt.s32.totalorder %v116_v57, 16  ;;  %vm195_vm8 = vcmp.ge.s32.totalorder %v115_v61, 0  ;;  %vm235_vm10 = vcmp.lt.s32.totalorder %v115_v61, 16 }
  0x69   :  { %vm216_vm6 = vmand %vm176_vm2, %vm196_vm3  ;;  %vm193_vm0 = vcmp.ge.s32.totalorder %v113_v7, 0  ;;  %vm233_vm2 = vcmp.lt.s32.totalorder %v113_v7, 16  ;;  %v2061_v61 = vmov 0 }
  0x6a   :  { %vm1361_vm9 = vmand %vm216_vm6, %vm236_vm7  ;;  %vm134_vm6 = vcmp.ge.s32.totalorder %v75_v11, 0  ;;  %vm154_vm7 = vcmp.lt.s32.totalorder %v75_v11, 16 }
  0x6b   :  { %vm215_vm15 = vmand %vm175_vm11, %vm195_vm8 }
  0x6c   :  { %vm1369_vm1 = vmand %vm215_vm15, %vm235_vm10 }
  0x6d   :  { %v1316_v47 = vpop.permute.xlu2 %345  ;;  %vm173_vm3 = vmand %vm133_vm12, %vm153_vm13 }
  0x6e   :  { %vm213_vm4 = vmand %vm173_vm3, %vm193_vm0 }
  0x6f   :  { %313 = vrot.lane.b32.xlu2 %v1248_v10, %s1164_s23  ;;  %574 = vrot.lane.b32.xlu0 %v565_v45, %s1163_s20  ;;  %v1355_v10 = vand.u32 127, %v319_v59  ;;  %vm1379_vm8 = vmand %vm213_vm4, %vm233_vm2 }
  0x70   :  { %466 = vrot.lane.b32.xlu1 %v457_v30, %s1160_s17  ;;  %v2043_v18 = vsel %vm1379_vm8, 4294967295, %v2042_v18  ;;  %vm174_vm11 = vmand %vm134_vm6, %vm154_vm7 }
  0x71   :  { %vm2031_vm14 = vcmp.lt.s32.totalorder %v1355_v10, 16  ;;  %vm2030_vm15 = vcmp.lt.s32.totalorder %v1355_v10, 15  ;;  %vm2029_vm0 = vcmp.lt.s32.totalorder %v1355_v10, 1  ;;  %vm2032_vm2 = vcmp.lt.s32.totalorder %v1355_v10, 113 }
  0x74   :  { %v1339_v58 = vpop.permute.xlu1 %50 }
  0x75   :  { %v1353_v8 = vpop.permute.xlu2 %385  ;;  %v67_v29 = vadd.s32 %v1339_v58, %v1344_v62  ;;  %v68_v31 = vadd.s32 %v1339_v58, %v1332_v53  ;;  %v69_v32 = vadd.s32 %v1339_v58, %v1326_v51 }
  0x76   :  { %v1367_v14 = vpop.permute.xlu0 %92 }
  0x77   :  { %341 = vrot.lane.b32.xlu2 %v1254_v13, %s1157_s0  ;;  %86 = vperm.xlu0 %1147, %v35_v40   ;;  %v114_v13 = vadd.s32 %v96_v44, %v1346_v63  ;;  %vm126_vm7 = vcmp.ge.s32.totalorder %v67_v29, 0  ;;  %vm146_vm4 = vcmp.lt.s32.totalorder %v67_v29, 16 }
  0x78   :  { %44 = vperm.xlu1 %1152, %v34_v49  }
  0x79   :  { %vm194_vm5 = vcmp.ge.s32.totalorder %v114_v13, 0  ;;  %vm234_vm10 = vcmp.lt.s32.totalorder %v114_v13, 16 }
  0x7a   :  { %vm214_vm12 = vmand %vm174_vm11, %vm194_vm5  ;;  %vm127_vm5 = vcmp.ge.s32.totalorder %v68_v31, 0  ;;  %vm2033_vm11 = vcmp.lt.s32.totalorder %v1355_v10, 127 }
  0x7b   :  { %vm1389_vm13 = vmand %vm214_vm12, %vm234_vm10  ;;  %vm147_vm10 = vcmp.lt.s32.totalorder %v68_v31, 16 }
  0x7c   :  { %v2045_v20 = vsel %vm1389_vm13, 4294967295, %v2044_v20 }
  0x7d   :  { %v1383_v19 = vpop.permute.xlu2 %415 }
  0x7f   :  { %1151 = vset.pattern.permute.xlu0 %v1155_v0  ;;  %729 = vperm.xlu2 %1150, %v726_v1  }
  0x80   :  { %1153 = vset.pattern.permute.xlu1 %v1156_v6  ;;  %53 = vperm.xlu0 %1151, %v1229_v4   ;;  %v2040_v6 = vmov 0 }
  0x81   :  { %83 = vperm.xlu1 %1153, %v34_v49   ;;  %v2041_v6 = vsel %vm1369_vm1, 4294967295, %v2040_v6  ;;  %v2054_v49 = vmov 0 }
  0x84   :  { %v1373_v4 = vpop.permute.xlu1 %347 }
  0x85   :  { %v350_v15 = vsel %vm2031_vm14, %v1316_v47, %v1373_v4  ;;  %vm1436_vm14 = vmand %vm126_vm7, %vm146_vm4 }
  0x86   :  { %v361_v16 = vrot.slane %v350_v15, 4 }
  0x88   :  { %409 = vrot.lane.b32.xlu0 %v1271_v22, %s1159_s16  ;;  %369 = vst [vmem:[#allocation2 + $0x18] sm:$0xf0] %v361_v16 }
  0x89   :  { %311 = vrot.lane.b32.xlu1 %v1245_v9, %s1164_s23 }
  0x8a   :  { %1154 = vset.pattern.permute.xlu1 %v1155_v0  ;;  %v736_v0 = vld [vmem:[%s2024_s4] sm:$0xf] }
  0x8c   :  { %v1395_v21 = vpop.permute.xlu0 %387 }
  0x8d   :  { %v390_v22 = vsel %vm2030_vm15, %v1353_v8, %v1395_v21  ;;  %vm148_vm15 = vcmp.lt.s32.totalorder %v69_v32, 16 }
  0x8e   :  { %397 = vst [vmem:[#allocation2 + $0x80] sm:$0xf] %v390_v22 }
  0x90   :  { %381 = vrot.lane.b32.xlu0 %v1263_v17, %s1158_s15  ;;  %v66_v17 = vadd.s32 %v1339_v58, %v1341_v60  ;;  %v2059_v58 = vmov 0 }
  0x91   :  { %v1403_v9 = vpop.permute.xlu2 %464 }
  0x92   :  { %vm125_vm3 = vcmp.ge.s32.totalorder %v66_v17, 0  ;;  %vm145_vm6 = vcmp.lt.s32.totalorder %v66_v17, 16 }
  0x93   :  { %vm1429_vm12 = vmand %vm125_vm3, %vm145_vm6 }
  0x94   :  { %v414_v23 = vpop.permute.xlu1 %413 }
  0x95   :  { %v418_v24 = vsel %vm2029_vm0, %v414_v23, %v1383_v19 }
  0x96   :  { %v429_v25 = vrot.slane %v418_v24, 4 }
  0x98   :  { %739 = vperm.xlu0 %1151, %v736_v0   ;;  %437 = vst [vmem:[#allocation2 + $0x80] sm:$0xf0] %v429_v25 }
  0x99   :  { %v511_v26 = vpop.permute.xlu2 %510 }
  0x9c   :  { %v1412_v27 = vpop.permute.xlu1 %411 }
  0x9d   :  { %v419_v28 = vsel %vm2029_vm0, %v1412_v27, %v414_v23  ;;  %vm128_vm0 = vcmp.ge.s32.totalorder %v69_v32, 0 }
  0x9e   :  { %v428_v30 = vrot.slane %v419_v28, 4  ;;  %vm1448_vm8 = vmand %vm128_vm0, %vm148_vm15 }
  0xa0   :  { %436 = vst [vmem:[#allocation2 + $0x78] sm:$0xf0] %v428_v30 }
  0xa1   :  { %v509_v33 = vpop.permute.xlu2 %508 }
  0xa2   :  { %v513_v34 = vsel %vm2032_vm2, %v509_v33, %v511_v26  ;;  %vm1441_vm2 = vmand %vm127_vm5, %vm147_vm10 }
  0xa3   :  { %519 = vst [vmem:[#allocation2 + $0x98] sm:$0xf] %v513_v34 }
  0xa4   :  { %v90_v35 = vpop.permute.xlu1 %89 }
  0xa5   :  { %v105_v37 = vadd.s32 %v90_v35, %v1335_v55  ;;  %v106_v38 = vadd.s32 %v90_v35, %v1346_v63  ;;  %v107_v39 = vadd.s32 %v90_v35, %v1328_v52  ;;  %v108_v42 = vadd.s32 %v90_v35, %v1324_v50 }
  0xa6   :  { %v471_v41 = vpop.permute.xlu0 %470 }
  0xa7   :  { %v476_v44 = vsel %vm2033_vm11, %v471_v41, %v1403_v9  ;;  %vm185_vm3 = vcmp.ge.s32.totalorder %v105_v37, 0  ;;  %vm225_vm6 = vcmp.lt.s32.totalorder %v105_v37, 16  ;;  %vm186_vm13 = vcmp.ge.s32.totalorder %v106_v38, 0 }
  0xa8   :  { %v484_v46 = vrot.slane %v476_v44, 4  ;;  %vm205_vm7 = vmand %vm1429_vm12, %vm185_vm3  ;;  %vm226_vm4 = vcmp.lt.s32.totalorder %v106_v38, 16  ;;  %vm187_vm10 = vcmp.ge.s32.totalorder %v107_v39, 0  ;;  %vm227_vm1 = vcmp.lt.s32.totalorder %v107_v39, 16 }
  0xa9   :  { %v535_v48 = vpop.permute.xlu2 %534  ;;  %vm1454_vm5 = vmand %vm205_vm7, %vm225_vm6  ;;  %vm188_vm0 = vcmp.ge.s32.totalorder %v108_v42, 0  ;;  %vm228_vm3 = vcmp.lt.s32.totalorder %v108_v42, 16  ;;  %vm2058_vm6 = vcmp.lt.s32.totalorder %v1355_v10, 127  ;;  %v1165_v39 = vmov 0.0  }
  0xaa   :  { %v2055_v49 = vsel %vm1454_vm5, 4294967295, %v2054_v49  ;;  %492 = vst [vmem:[#allocation2 + $0x40] sm:$0xf0] %v484_v46  ;;  %vm206_vm11 = vmand %vm1436_vm14, %vm186_vm13  ;;  %v1510_v40 = vsel %vm1361_vm9, 1.0, %v1165_v39  ;;  %vm2069_vm9 = vcmp.lt.s32.totalorder %v1355_v10, 15 }
  0xab   :  { %vm1460_vm15 = vmand %vm206_vm11, %vm226_vm4  ;;  %vm2064_vm11 = vcmp.lt.s32.totalorder %v1355_v10, 16 }
  0xac   :  { %v2057_v54 = vsel %vm1460_vm15, 4294967295, %v2056_v54  ;;  %v1464_v56 = vpop.permute.xlu1 %468  ;;  %vm207_vm12 = vmand %vm1441_vm2, %vm187_vm10  ;;  %vm2063_vm2 = vcmp.lt.s32.totalorder %v1355_v10, 113  ;;  %vm2034_vm10 = vcmp.lt.s32.totalorder %v1355_v10, 111 }
  0xad   :  { %v473_v57 = vsel %vm2058_vm6, %v1464_v56, %v471_v41  ;;  %vm1471_vm7 = vmand %vm207_vm12, %vm227_vm1  ;;  %vm2035_vm1 = vcmp.lt.s32.totalorder %v1355_v10, 112  ;;  %vm2037_vm6 = vcmask 1043456  }
  0xae   :  { %v2060_v58 = vsel %vm1471_vm7, 4294967295, %v2059_v58  ;;  %v483_v59 = vrot.slane %v473_v57, 4  ;;  %vm208_vm14 = vmand %vm1448_vm8, %vm188_vm0  ;;  %vm2036_vm0 = vcmp.lt.s32.totalorder %v1355_v10, 17 }
  0xaf   :  { %vm1477_vm13 = vmand %vm208_vm14, %vm228_vm3  ;;  %vm2070_vm14 = vnez %v2041_v6 }
  0xb0   :  { %v2062_v61 = vsel %vm1477_vm13, 4294967295, %v2061_v61  ;;  %491 = vst [vmem:[#allocation2 + $0x28] sm:$0xf0] %v483_v59  ;;  %vm2065_vm8 = vmmov %vm2063_vm2 }
  0xb1   :  { %v1481_v1 = vpop.permute.xlu2 %47  ;;  %vm2066_vm4 = vmmov %vm2063_vm2 }
  0xb2   :  { %vm2067_vm12 = vmmov %vm2064_vm11 }
  0xb3   :  { %vm2068_vm3 = vmmov %vm2064_vm11 }
  0xb4   :  { %v505_v2 = vpop.permute.xlu1 %504 }
  0xb5   :  { %v516_v7 = vsel %vm2063_vm2, %v511_v26, %v505_v2  ;;  %vm2071_vm2 = vcmp.lt.s32.totalorder %v1355_v10, 127 }
  0xb6   :  { %520 = vst [vmem:[#allocation2 + $0x60] sm:$0xf] %v516_v7 }
  0xb9   :  { %v344_v11 = vpop.permute.xlu2 %343  ;;  %v533_v13 = vpop.permute.xlu0 %532 }
  0xba   :  { %v351_v15 = vsel %vm2064_vm11, %v344_v11, %v1316_v47  ;;  %v543_v16 = vsel %vm2035_vm1, %v533_v13, %v535_v48  ;;  %vm2072_vm11 = vmmov %vm2071_vm2 }
  0xbb   :  { %v360_v22 = vrot.slane %v351_v15, 4  ;;  %v549_v23 = vrot.slane %v543_v16, 4 }
  0xbd   :  { %368 = vst [vmem:[#allocation2 + $0x50] sm:$0xf0] %v360_v22 }
  0xbe   :  { %557 = vst [vmem:[#allocation2 + $0x58] sm:$0xf0] %v549_v23 }
  0xc1   :  { %v507_v0 = vpop.permute.xlu2 %506  ;;  %v539_v24 = vpop.permute.xlu0 %538 }
  0xc2   :  { %v514_v25 = vsel %vm2065_vm8, %v507_v0, %v509_v33  ;;  %v515_v26 = vsel %vm2066_vm4, %v505_v2, %v507_v0  ;;  %v544_v17 = vsel %vm2035_vm1, %v539_v24, %v533_v13  ;;  %v573_v28 = vpop.permute.xlu1 %572  ;;  %vm2073_vm8 = vnez %v2043_v18 }
  0xc3   :  { %517 = vst [vmem:[#allocation2 + $0x58] sm:$0xf] %v515_v26  ;;  %v552_v47 = vrot.slane %v544_v17, 4  ;;  %v64_v26 = vadd.s32 %v1481_v1, %v1332_v53  ;;  %v65_v17 = vadd.s32 %v1481_v1, %v1326_v51  ;;  %vm2074_vm4 = vnez %v2045_v20 }
  0xc4   :  { %518 = vst [vmem:[#allocation2 + $0x10] sm:$0xf] %v514_v25  ;;  %v109_v20 = vadd.s32 %v1367_v14, %v1335_v55 }
  0xc5   :  { %560 = vst [vmem:[#allocation2 + $0x60] sm:$0xf0] %v552_v47 }
  0xc9   :  { %v1498_v29 = vpop.permute.xlu2 %313  ;;  %v537_v30 = vpop.permute.xlu0 %536 }
  0xca   :  { %v541_v31 = vsel %vm2035_vm1, %v537_v30, %v539_v24  ;;  %v542_v32 = vsel %vm2035_vm1, %v535_v48, %v537_v30  ;;  %v579_v33 = vpop.permute.xlu1 %578 }
  0xcb   :  { %v550_v34 = vrot.slane %v542_v32, 4  ;;  %v551_v35 = vrot.slane %v541_v31, 4  ;;  %v584_v36 = vsel %vm2034_vm10, %v579_v33, %v573_v28  ;;  %v63_v31 = vadd.s32 %v1481_v1, %v1344_v62 }
  0xcc   :  { %588 = vst [vmem:[#allocation2 + $0x90] sm:$0xf] %v584_v36  ;;  %v1566_v32 = vsel %vm2073_vm8, 1.0, %v1165_v39 }
  0xcd   :  { %558 = vst [vmem:[#allocation2 + $0x10] sm:$0xf0] %v550_v34  ;;  %vm122_vm1 = vcmp.ge.s32.totalorder %v63_v31, 0 }
  0xce   :  { %559 = vst [vmem:[#allocation2 + $0x98] sm:$0xf0] %v551_v35 }
  0xd1   :  { %v342_v37 = vpop.permute.xlu2 %341  ;;  %v316_v38 = vpop.permute.xlu0 %315 }
  0xd2   :  { %v352_v41 = vsel %vm2067_vm12, %v342_v37, %v344_v11  ;;  %v353_v42 = vsel %vm2068_vm3, %v1373_v4, %v342_v37  ;;  %v323_v43 = vsel %vm2036_vm0, %v1498_v29, %v316_v38  ;;  %v577_v44 = vpop.permute.xlu1 %576  ;;  %v1538_v11 = vsel %vm2070_vm14, 1.0, %v1165_v39 }
  0xd3   :  { %v358_v45 = vrot.slane %v353_v42, 4  ;;  %v359_v46 = vrot.slane %v352_v41, 4  ;;  %328 = vst [vmem:[#allocation2 + $0x50] sm:$0xf] %v323_v43  ;;  %v581_v12 = vsel %vm2034_vm10, %v577_v44, %v579_v33  ;;  %v608_v48 = vld [vmem:[#allocation2 + $0x90] sm:$0xf]  ;;  %v110_v42 = vadd.s32 %v1367_v14, %v1346_v63 }
  0xd4   :  { %587 = vst [vmem:[#allocation2 + $0x70] sm:$0xf] %v581_v12  ;;  %v628_v57 = vmul.f32 %v1510_v40, %v608_v48  ;;  %v1571_v33 = vsel %vm2074_vm4, 1.0, %v1165_v39  ;;  %vm123_vm12 = vcmp.ge.s32.totalorder %v64_v26, 0  ;;  %vm143_vm3 = vcmp.lt.s32.totalorder %v64_v26, 16 }
  0xd5   :  { %366 = vst [vmem:[#allocation2] sm:$0xf0] %v358_v45  ;;  %vm144_vm14 = vcmp.lt.s32.totalorder %v65_v17, 16  ;;  %v1608_v12 = vadd.s32 %v1367_v14, %v1324_v50 }
  0xd6   :  { %367 = vst [vmem:[#allocation2 + $0x38] sm:$0xf0] %v359_v46  ;;  %1123 = vmatpush.msk.msra.mxu3 %vm2037_vm6, %v628_v57  ;;  %v1604_v46 = vadd.s32 %v1367_v14, %v1328_v52  ;;  %v2083_v14 = vmov 0 }
  0xd9   :  { %v1524_v4 = vpop.permute.xlu0 %383 }
  0xda   :  { %v391_v59 = vsel %vm2069_vm9, %v1524_v4, %v1353_v8  ;;  %v1530_v2 = vpop.permute.xlu1 %317  ;;  %vm124_vm9 = vcmp.ge.s32.totalorder %v65_v17, 0 }
  0xdb   :  { %396 = vst [vmem:[#allocation2 + $0x78] sm:$0xf] %v391_v59  ;;  %v322_v7 = vsel %vm2036_vm0, %v316_v38, %v1530_v2  ;;  %v607_v13 = vld [vmem:[#allocation2 + $0x70] sm:$0xf]  ;;  %vm142_vm0 = vcmp.lt.s32.totalorder %v63_v31, 16 }
  0xdc   :  { %329 = vst [vmem:[#allocation2 + $0x18] sm:$0xf] %v322_v7  ;;  %v627_v15 = vmul.f32 %v1538_v11, %v607_v13  ;;  %v2081_v7 = vmov 0 }
  0xde   :  { %1121 = vmatpush.msk.msra.mxu2 %vm2037_vm6, %v627_v15  ;;  %v2085_v15 = vmov 0 }
  0xe1   :  { %v575_v16 = vpop.permute.xlu0 %574 }
  0xe2   :  { %v582_v8 = vsel %vm2034_vm10, %v575_v16, %v577_v44  ;;  %v583_v22 = vsel %vm2034_vm10, %v573_v28, %v575_v16  ;;  %v467_v23 = vpop.permute.xlu1 %466  ;;  %vm1585_vm10 = vmand %vm124_vm9, %vm144_vm14 }
  0xe3   :  { %585 = vst [vmem:[#allocation2 + $0x20] sm:$0xf] %v583_v22  ;;  %v474_v6 = vsel %vm2071_vm2, %v467_v23, %v1464_v56  ;;  %v475_v0 = vsel %vm2072_vm11, %v1403_v9, %v467_v23  ;;  %v62_v9 = vadd.s32 %v1481_v1, %v1341_v60  ;;  %vm163_vm11 = vmand %vm123_vm12, %vm143_vm3 }
  0xe4   :  { %586 = vst [vmem:[#allocation2 + $0x48] sm:$0xf] %v582_v8  ;;  %v481_v24 = vrot.slane %v475_v0, 4  ;;  %v482_v25 = vrot.slane %v474_v6, 4  ;;  %vm1615_vm14 = vmand %vm122_vm1, %vm142_vm0  ;;  %v2088_v8 = vmov 0  ;;  %vm2090_vm1 = vcmp.ge.s32.totalorder %v109_v20, 0 }
  0xe5   :  { %vm121_vm8 = vcmp.ge.s32.totalorder %v62_v9, 0  ;;  %vm141_vm4 = vcmp.lt.s32.totalorder %v62_v9, 16  ;;  %v2082_v7 = vsel %vm1615_vm14, 4294967295, %v2081_v7  ;;  %vm229_vm14 = vcmp.lt.s32.totalorder %v109_v20, 16 }
  0xe6   :  { %489 = vst [vmem:[#allocation2 + $0x8] sm:$0xf0] %v481_v24  ;;  %vm1597_vm3 = vmand %vm121_vm8, %vm141_vm4  ;;  %v592_v24 = vld [vmem:[#allocation2 + $0x18] sm:$0xff] }
  0xe7   :  { %490 = vst [vmem:[#allocation2 + $0x88] sm:$0xf0] %v482_v25 }
  0xe9   :  { %v87_v28 = vpop.permute.xlu0 %86 }
  0xea   :  { %v103_v47 = vadd.s32 %v87_v28, %v1328_v52  ;;  %v1557_v30 = vpop.permute.xlu1 %44  ;;  %v605_v56 = vld [vmem:[#allocation2 + $0x20] sm:$0xf]  ;;  %v104_v37 = vadd.s32 %v87_v28, %v1324_v50  ;;  %v1577_v18 = vadd.s32 %v87_v28, %v1335_v55  ;;  %v1620_v13 = vadd.s32 %v87_v28, %v1346_v63 }
  0xeb   :  { %v606_v34 = vld [vmem:[#allocation2 + $0x48] sm:$0xf]  ;;  %v625_v35 = vmul.f32 %v1566_v32, %v605_v56  ;;  %v60_v1 = vadd.s32 %v1557_v30, %v1332_v53  ;;  %v61_v43 = vadd.s32 %v1557_v30, %v1326_v51  ;;  %v58_v38 = vadd.s32 %v1557_v30, %v1341_v60 }
  0xec   :  { %v626_v36 = vmul.f32 %v1571_v33, %v606_v34  ;;  %vm183_vm2 = vcmp.ge.s32.totalorder %v103_v47, 0  ;;  %vm184_vm12 = vcmp.ge.s32.totalorder %v104_v37, 0  ;;  %vm2087_vm7 = vcmp.ge.s32.totalorder %v1577_v18, 0 }
  0xed   :  { %1117 = vmatpush.msk.msra.mxu0 %vm2037_vm6, %v625_v35  ;;  %vm1589_vm13 = vmand %vm163_vm11, %vm183_vm2  ;;  %vm140_vm15 = vcmp.lt.s32.totalorder %v61_v43, 16  ;;  %vm2091_vm9 = vcmp.lt.s32.totalorder %v60_v1, 16  ;;  %v59_v45 = vadd.s32 %v1557_v30, %v1344_v62 }
  0xee   :  { %1119 = vmatpush.msk.msra.mxu1 %vm2037_vm6, %v626_v36  ;;  %vm223_vm6 = vcmp.lt.s32.totalorder %v103_v47, 16  ;;  %vm1632_vm8 = vmand %vm1585_vm10, %vm184_vm12 }
  0xef   :  { %vm1625_vm11 = vmand %vm1589_vm13, %vm223_vm6  ;;  %v2086_v15 = vsel %vm1632_vm8, 4294967295, %v2085_v15  ;;  %vm2092_vm8 = vcmp.ge.s32.totalorder %v60_v1, 0  ;;  %v599_v1 = vld [vmem:[#allocation2 + $0x28] sm:$0xff] }
  0xf0   :  { %v2084_v14 = vsel %vm1625_vm11, 4294967295, %v2083_v14  ;;  %vm1641_vm13 = vmand %vm1597_vm3, %vm2087_vm7  ;;  %vm190_vm3 = vcmp.ge.s32.totalorder %v110_v42, 0 }
  0xf1   :  { %v2089_v8 = vsel %vm1641_vm13, 4294967295, %v2088_v8  ;;  %vm1649_vm5 = vmand %vm2092_vm8, %vm2091_vm9  ;;  %vm230_vm13 = vcmp.lt.s32.totalorder %v110_v42, 16  ;;  %vm2095_vm9 = vnez %v2055_v49  ;;  %vm2097_vm8 = vnez %v2086_v15  ;;  %v603_v42 = vld [vmem:[#allocation2 + $0x98] sm:$0xff] }
  0xf2   :  { %v54_v44 = vpop.permute.xlu0 %53  ;;  %v1663_v0 = vsel %vm2095_vm9, 1.0, %v1165_v39  ;;  %vm192_vm9 = vcmp.ge.s32.totalorder %v1608_v12, 0 }
  0xf3   :  { %v70_v48 = vadd.s32 %v54_v44, %v1341_v60  ;;  %v71_v57 = vadd.s32 %v54_v44, %v1344_v62  ;;  %v1612_v59 = vpop.permute.xlu1 %83  ;;  %v72_v16 = vadd.s32 %v54_v44, %v1332_v53  ;;  %v73_v22 = vadd.s32 %v54_v44, %v1326_v51  ;;  %v597_v53 = vld [vmem:[#allocation2 + $0x8] sm:$0xff]  ;;  %v601_v51 = vld [vmem:[#allocation2 + $0x58] sm:$0xff] }
  0xf4   :  { %v617_v49 = vmul.f32 %v1663_v0, %v597_v53  ;;  %v1684_v28 = vadd.s32 %v1612_v59, %v1328_v52  ;;  %v98_v15 = vadd.s32 %v1612_v59, %v1346_v63  ;;  %v591_v63 = vld [vmem:[#allocation2 + $0x50] sm:$0xff]  ;;  %v297_v53 = vld [vmem:[%s2025_s1] sm:$0xf] }
  0xf5   :  { %vm129_vm4 = vcmp.ge.s32.totalorder %v70_v48, 0  ;;  %vm149_vm2 = vcmp.lt.s32.totalorder %v70_v48, 16  ;;  %vm130_vm10 = vcmp.ge.s32.totalorder %v71_v57, 0  ;;  %vm150_vm12 = vcmp.lt.s32.totalorder %v71_v57, 16  ;;  %v595_v48 = vld [vmem:[#allocation2 + $0x78] sm:$0xff]  ;;  %v604_v57 = vld [vmem:[#allocation2 + $0x60] sm:$0xff] }
  0xf6   :  { %vm169_vm6 = vmand %vm129_vm4, %vm149_vm2  ;;  %vm182_vm4 = vcmp.ge.s32.totalorder %v1620_v13, 0  ;;  %vm151_vm11 = vcmp.lt.s32.totalorder %v72_v16, 16 }
  0xf7   :  { %vm209_vm0 = vmand %vm169_vm6, %vm2090_vm1  ;;  %vm131_vm6 = vcmp.ge.s32.totalorder %v72_v16, 0 }
  0xf8   :  { %vm249_vm7 = vmand %vm209_vm0, %vm229_vm14  ;;  %vm2096_vm14 = vcmp.lt.s32.totalorder %v104_v37, 16  ;;  %v602_v37 = vld [vmem:[#allocation2 + $0x10] sm:$0xff] }
  0xf9   :  { %v1656_v6 = vsel %vm249_vm7, 1.0, %v1165_v39  ;;  %vm170_vm1 = vmand %vm130_vm10, %vm150_vm12  ;;  %vm2100_vm7 = vcmp.ge.s32.totalorder %v61_v43, 0  ;;  %vm231_vm12 = vcmp.lt.s32.totalorder %v1604_v46, 16 }
  0xfa   :  { %vm1668_vm0 = vmand %vm2097_vm8, %vm2096_vm14  ;;  %v410_v26 = vpop.permute.xlu0 %409  ;;  %v621_v17 = vmul.f32 %v1656_v6, %v601_v51  ;;  %vm2105_vm8 = vnez %v2082_v7  ;;  %v600_v7 = vld [vmem:[#allocation2 + $0x40] sm:$0xff] }
  0xfb   :  { %vm1674_vm2 = vmand %vm2100_vm7, %vm140_vm15  ;;  %vm2103_vm15 = vcmp.lt.s32.totalorder %v1355_v10, 1  ;;  %v312_v9 = vpop.permute.xlu1 %311  ;;  %v1796_v16 = vsel %vm1668_vm0, 1.0, %v1165_v39 }
  0xfc   :  { %vm210_vm10 = vmand %vm170_vm1, %vm190_vm3  ;;  %v420_v47 = vsel %vm2103_vm15, %v410_v26, %v1412_v27  ;;  %vm132_vm1 = vcmp.ge.s32.totalorder %v73_v22, 0  ;;  %658 = vmatpush.msra.mxu0 %v621_v17 }
  0xfd   :  { %vm2104_vm14 = vmmov %vm2103_vm15  ;;  %v427_v34 = vrot.slane %v420_v47, 4  ;;  %vm2108_vm15 = vcmp.lt.s32.totalorder %v1355_v10, 17 }
  0xfe   :  { %v421_v56 = vsel %vm2104_vm14, %v1383_v19, %v410_v26  ;;  %vm250_vm3 = vmand %vm210_vm10, %vm230_vm13  ;;  %v325_v27 = vsel %vm2108_vm15, %v1530_v2, %v312_v9  ;;  %vm152_vm13 = vcmp.lt.s32.totalorder %v73_v22, 16  ;;  %v1708_v19 = vadd.s32 %v1612_v59, %v1324_v50  ;;  %v598_v2 = vld [vmem:[#allocation2 + $0x88] sm:$0xff]  ;;  %659 = vmatpush.msra.mxu0 %v617_v49 }
  0xff   :  { %vm1697_vm7 = vmand %vm2105_vm8, %vm182_vm4  ;;  %v426_v52 = vrot.slane %v421_v56, 4  ;;  %326 = vst [vmem:[#allocation2] sm:$0xf] %v325_v27  ;;  %v1714_v36 = vsel %vm250_vm3, 1.0, %v1165_v39  ;;  %vm2110_vm10 = vcmp.ge.s32.totalorder %v1604_v46, 0  ;;  %vm2111_vm3 = vnez %v2057_v54 }
 0x100   :  { %vm171_vm14 = vmand %vm131_vm6, %vm151_vm11  ;;  %vm221_vm11 = vcmp.lt.s32.totalorder %v1577_v18, 16  ;;  %v622_v20 = vmul.f32 %v1714_v36, %v602_v37  ;;  %v1726_v50 = vsel %vm2111_vm3, 1.0, %v1165_v39  ;;  %435 = vst [vmem:[#allocation2 + $0x68] sm:$0xf0] %v427_v34  ;;  %v97_v46 = vadd.s32 %v1612_v59, %v1335_v55  ;;  %v596_v59 = vld [vmem:[#allocation2 + $0x80] sm:$0xff] }
 0x101   :  { %vm2109_vm4 = vmmov %vm2108_vm15  ;;  %434 = vst [vmem:[#allocation2 + $0x30] sm:$0xf0] %v426_v52  ;;  %vm232_vm15 = vcmp.lt.s32.totalorder %v1608_v12, 16  ;;  %v618_v60 = vmul.f32 %v1726_v50, %v598_v2  ;;  %v616_v51 = vmul.f32 %v1796_v16, %v596_v59 }
 0x102   :  { %v324_v35 = vsel %vm2109_vm4, %v312_v9, %v1498_v29  ;;  %vm211_vm8 = vmand %vm171_vm14, %vm2110_vm10  ;;  %vm2112_vm14 = vnez %v2060_v58  ;;  %vm2113_vm4 = vnez %v2084_v14  ;;  %vm179_vm10 = vcmp.ge.s32.totalorder %v1684_v28, 0  ;;  %678 = vmatpush.msra.mxu1 %v622_v20  ;;  %v382_v30 = vpop.permute.xlu0 %381 }
 0x103   :  { %vm251_vm6 = vmand %vm211_vm8, %vm231_vm12  ;;  %v1731_v29 = vsel %vm2112_vm14, 1.0, %v1165_v39  ;;  %v1743_v54 = vsel %vm2113_vm4, 1.0, %v1165_v39  ;;  %327 = vst [vmem:[#allocation2 + $0x38] sm:$0xf] %v324_v35  ;;  %vm180_vm14 = vcmp.ge.s32.totalorder %v1708_v19, 0  ;;  %vm2118_vm4 = vcmp.lt.s32.totalorder %v1355_v10, 15 }
 0x104   :  { %v1736_v41 = vsel %vm251_vm6, 1.0, %v1165_v39  ;;  %vm172_vm12 = vmand %vm132_vm1, %vm152_vm13  ;;  %vm2114_vm6 = vnez %v2062_v61  ;;  %vm219_vm1 = vcmp.lt.s32.totalorder %v1684_v28, 16  ;;  %vm2115_vm13 = vnez %v2089_v8  ;;  %679 = vmatpush.msra.mxu1 %v618_v60 }
 0x105   :  { %v623_v58 = vmul.f32 %v1736_v41, %v603_v42  ;;  %vm212_vm8 = vmand %vm172_vm12, %vm192_vm9  ;;  %v1753_v43 = vsel %vm2114_vm6, 1.0, %v1165_v39  ;;  %v619_v61 = vmul.f32 %v1731_v29, %v599_v1  ;;  %v615_v62 = vmul.f32 %v1743_v54, %v595_v48 }
 0x106   :  { %vm1760_vm3 = vmand %vm2115_vm13, %vm221_vm11  ;;  %vm222_vm12 = vcmp.lt.s32.totalorder %v1620_v13, 16  ;;  %v392_v12 = vsel %vm2118_vm4, %v382_v30, %v1524_v4  ;;  %vm117_vm13 = vcmp.ge.s32.totalorder %v58_v38, 0  ;;  %vm177_vm0 = vcmp.ge.s32.totalorder %v97_v46, 0  ;;  %v589_v17 = vld [vmem:[#allocation2] sm:$0xff] }
 0x107   :  { %vm252_vm9 = vmand %vm212_vm8, %vm232_vm15  ;;  %698 = vmatpush.msra.mxu2 %v623_v58  ;;  %vm220_vm15 = vcmp.lt.s32.totalorder %v1708_v19, 16  ;;  %395 = vst [vmem:[#allocation2 + $0x68] sm:$0xf] %v392_v12  ;;  %v1832_v25 = vsel %vm1760_vm3, 1.0, %v1165_v39  ;;  %v730_v19 = vpop.permute.xlu2 %729  ;;  %vm2122_vm3 = vcmp.lt.s32.totalorder %v1355_v10, 112 }
 0x108   :  { %v1773_v18 = vsel %vm252_vm9, 1.0, %v1165_v39  ;;  %vm199_vm11 = vmand %vm1649_vm5, %vm179_vm10  ;;  %vm137_vm10 = vcmp.lt.s32.totalorder %v58_v38, 16 }
 0x109   :  { %v624_v55 = vmul.f32 %v1773_v18, %v604_v57  ;;  %vm2119_vm8 = vmmov %vm2118_vm4  ;;  %699 = vmatpush.msra.mxu2 %v619_v61  ;;  %vm138_vm4 = vcmp.lt.s32.totalorder %v59_v45, 16 }
 0x10a   :  { %v393_v14 = vsel %vm2119_vm8, %v1395_v21, %v382_v30  ;;  %vm239_vm6 = vmand %vm199_vm11, %vm219_vm1  ;;  %v620_v21 = vmul.f32 %v1753_v43, %v600_v7  ;;  %v590_v56 = vld [vmem:[#allocation2 + $0x38] sm:$0xff]  ;;  %v740_v2 = vpop.permute.xlu0 %739 }
 0x10b   :  { %394 = vst [vmem:[#allocation2 + $0x30] sm:$0xf] %v393_v14  ;;  %v1799_v4 = vsel %vm239_vm6, 1.0, %v1165_v39  ;;  %vm200_vm5 = vmand %vm1674_vm2, %vm180_vm14  ;;  %718 = vmatpush.msra.mxu3 %v624_v55  ;;  %700 = vmatpush.msra.mxu2 %v615_v62  ;;  %vm629_vm2 = vcmask 293888   ;;  %vm217_vm14 = vcmp.lt.s32.totalorder %v97_v46, 16  ;;  %vm178_vm6 = vcmp.ge.s32.totalorder %v98_v15, 0 }
 0x10c   :  { %vm240_vm1 = vmand %vm200_vm5, %vm220_vm15  ;;  %v611_v8 = vmul.f32 %v1799_v4, %v591_v63  ;;  %vm118_vm15 = vcmp.ge.s32.totalorder %v59_v45, 0 }
 0x10d   :  { %v1810_v22 = vsel %vm240_vm1, 1.0, %v1165_v39  ;;  %vm1819_vm9 = vmand %vm1697_vm7, %vm222_vm12  ;;  %719 = vmatpush.msra.mxu3 %v620_v21  ;;  %vm218_vm12 = vcmp.lt.s32.totalorder %v98_v15, 16 }
 0x10e   :  { %vm157_vm11 = vmand %vm117_vm13, %vm137_vm10  ;;  %701 = vmatpush.msra.mxu2 %v611_v8  ;;  %v612_v13 = vmul.f32 %v1810_v22, %v592_v24  ;;  %v1839_v28 = vsel %vm1819_vm9, 1.0, %v1165_v39  ;;  %v594_v47 = vld [vmem:[#allocation2 + $0x68] sm:$0xff]  ;;  %vm2125_vm9 = vcmp.lt.s32.totalorder %v1355_v10, 127 }
 0x10f   :  { %vm197_vm8 = vmand %vm157_vm11, %vm177_vm0  ;;  %720 = vmatpush.msra.mxu3 %v616_v51  ;;  %1122 = vmatmul.msk.f32.vlgmr.msra.gmra.mxu2 %vm629_vm2, %v297_v53  ;;  %v614_v9 = vmul.f32 %v1839_v28, %v594_v47  ;;  %vm2124_vm0 = vcmp.lt.s32.totalorder %v1355_v10, 111 }
 0x110   :  { %vm237_vm7 = vmand %vm197_vm8, %vm217_vm14  ;;  %vm2130_vm8 = vcmask 1043456  }
 0x111   :  { %vm158_vm5 = vmand %vm118_vm15, %vm138_vm4  ;;  %721 = vmatpush.msra.mxu3 %v612_v13  ;;  %v1843_v31 = vsel %vm237_vm7, 1.0, %v1165_v39  ;;  %680 = vmatpush.msra.mxu1 %v614_v9  ;;  %vm2129_vm4 = vcmp.lt.s32.totalorder %v1355_v10, 1 }
 0x112   :  { %v593_v26 = vld [vmem:[#allocation2 + $0x30] sm:$0xff]  ;;  %vm198_vm13 = vmand %vm158_vm5, %vm178_vm6  ;;  %1124 = vmatmul.msk.f32.vlgmr.msra.gmra.mxu3 %vm629_vm2, %v297_v53  ;;  %v609_v52 = vmul.f32 %v1843_v31, %v589_v17 }
 0x113   :  { %v613_v49 = vmul.f32 %v1832_v25, %v593_v26  ;;  %vm238_vm10 = vmand %vm198_vm13, %vm218_vm12  ;;  %vm2133_vm12 = vcmp.lt.s32.totalorder %v1355_v10, 113 }
 0x114   :  { %v1847_v34 = vsel %vm238_vm10, 1.0, %v1165_v39  ;;  %vm2123_vm1 = vmmov %vm2122_vm3 }
 0x115   :  { %660 = vmatpush.msra.mxu0 %v613_v49  ;;  %v610_v27 = vmul.f32 %v1847_v34, %v590_v56  ;;  %vm2126_vm14 = vmmov %vm2124_vm0 }
 0x116   :  { %vm2127_vm11 = vmmov %vm2124_vm0 }
 0x117   :  { %661 = vmatpush.msra.mxu0 %v609_v52  ;;  %681 = vmatpush.msra.mxu1 %v610_v27  ;;  %vm2128_vm15 = vmmov %vm2124_vm0 }
 0x118   :  { %1118 = vmatmul.msk.f32.vlgmr.msra.gmra.mxu0 %vm629_vm2, %v297_v53  ;;  %1120 = vmatmul.msk.f32.vlgmr.msra.gmra.mxu1 %vm629_vm2, %v297_v53  ;;  %vm2131_vm6 = vmmov %vm2130_vm8 }
 0x119   :  { %vm2132_vm7 = vmmov %vm2125_vm9 }
 0x11a   :  { %vm2134_vm5 = vmmov %vm2133_vm12 }
 0x11b   :  { %vm2135_vm13 = vmmov %vm2131_vm6 }
 0x11c   :  { %vm2136_vm10 = vmmov %vm2131_vm6 }
 0x192   :  { %v703_v35 = vpop.f32.mrf.mxu2 }
 0x193   :  { %v734_v37 = vmul.f32 %v730_v19, %v703_v35 }
 0x195   :  { %v663_v20 = vpop.f32.mrf.mxu0  ;;  %v744_v1 = vadd.f32 %v740_v2, %v734_v37  ;;  %v723_v38 = vpop.f32.mrf.mxu3 }
 0x196   :  { %v732_v42 = vmul.f32 %v730_v19, %v663_v20  ;;  %v683_v58 = vpop.f32.mrf.mxu1  ;;  %v735_v39 = vmul.f32 %v730_v19, %v723_v38 }
 0x197   :  { %v733_v60 = vmul.f32 %v730_v19, %v683_v58  ;;  %v748_v44 = vmax.f32 %v744_v1, 0.0 }
 0x198   :  { %v742_v45 = vadd.f32 %v740_v2, %v732_v42  ;;  %v745_v46 = vadd.f32 %v740_v2, %v735_v39 }
 0x199   :  { %v743_v61 = vadd.f32 %v740_v2, %v733_v60  ;;  %841 = vst [vmem:[#allocation2 + $0x28] sm:$0xf] %v748_v44 }
 0x19a   :  { %v746_v48 = vmax.f32 %v742_v45, 0.0  ;;  %v749_v57 = vmax.f32 %v745_v46, 0.0 }
 0x19b   :  { %v747_v7 = vmax.f32 %v743_v61, 0.0 }
 0x19c   :  { %839 = vst [vmem:[#allocation2 + $0x8] sm:$0xf] %v746_v48  ;;  %871 = vrot.lane.b32.xlu2 %v746_v48, %s1161_s18  ;;  %843 = vrot.lane.b32.xlu0 %v746_v48, %s1160_s17 }
 0x19d   :  { %842 = vst [vmem:[#allocation2 + $0x40] sm:$0xf] %v749_v57  ;;  %887 = vrot.lane.b32.xlu1 %v746_v48, %s1162_s19 }
 0x19e   :  { %840 = vst [vmem:[#allocation2 + $0x88] sm:$0xf] %v747_v7 }
 0x1a4   :  { %813 = vrot.lane.b32.xlu2 %v747_v7, %s1159_s16  ;;  %889 = vrot.lane.b32.xlu0 %v747_v7, %s1162_s19 }
 0x1a5   :  { %915 = vrot.lane.b32.xlu1 %v746_v48, %s1163_s20 }
 0x1ac   :  { %797 = vrot.lane.b32.xlu2 %v747_v7, %s1158_s15  ;;  %845 = vrot.lane.b32.xlu0 %v747_v7, %s1160_s17 }
 0x1ad   :  { %917 = vrot.lane.b32.xlu1 %v747_v7, %s1163_s20 }
 0x1b4   :  { %753 = vrot.lane.b32.xlu2 %v747_v7, %s1164_s23  ;;  %811 = vrot.lane.b32.xlu0 %v746_v48, %s1159_s16 }
 0x1b5   :  { %769 = vrot.lane.b32.xlu1 %v747_v7, %s1157_s0 }
 0x1bc   :  { %893 = vrot.lane.b32.xlu2 %v749_v57, %s1162_s19  ;;  %877 = vrot.lane.b32.xlu0 %v749_v57, %s1161_s18 }
 0x1bd   :  { %873 = vrot.lane.b32.xlu1 %v747_v7, %s1161_s18 }
 0x1c4   :  { %921 = vrot.lane.b32.xlu2 %v749_v57, %s1163_s20  ;;  %815 = vrot.lane.b32.xlu0 %v748_v44, %s1159_s16 }
 0x1c5   :  { %849 = vrot.lane.b32.xlu1 %v749_v57, %s1160_s17 }
 0x1cc   :  { %919 = vrot.lane.b32.xlu2 %v748_v44, %s1163_s20  ;;  %875 = vrot.lane.b32.xlu0 %v748_v44, %s1161_s18 }
 0x1cd   :  { %891 = vrot.lane.b32.xlu1 %v748_v44, %s1162_s19 }
 0x1d4   :  { %847 = vrot.lane.b32.xlu2 %v748_v44, %s1160_s17  ;;  %799 = vrot.lane.b32.xlu0 %v748_v44, %s1158_s15 }
 0x1d5   :  { %817 = vrot.lane.b32.xlu1 %v749_v57, %s1159_s16 }
 0x1dc   :  { %773 = vrot.lane.b32.xlu2 %v749_v57, %s1157_s0  ;;  %757 = vrot.lane.b32.xlu0 %v749_v57, %s1164_s23 }
 0x1dd   :  { %771 = vrot.lane.b32.xlu1 %v748_v44, %s1157_s0 }
 0x1e4   :  { %755 = vrot.lane.b32.xlu2 %v748_v44, %s1164_s23  ;;  %751 = vrot.lane.b32.xlu0 %v746_v48, %s1164_s23 }
 0x1e5   :  { %801 = vrot.lane.b32.xlu1 %v749_v57, %s1158_s15 }
 0x1ec   :  { %795 = vrot.lane.b32.xlu2 %v746_v48, %s1158_s15 }
 0x1ed   :  { %767 = vrot.lane.b32.xlu1 %v746_v48, %s1157_s0 }
 0x1f6   :  { %v872_v62 = vpop.permute.xlu2 %871 }
 0x1fe   :  { %v814_v30 = vpop.permute.xlu2 %813 }
 0x206   :  { %v1884_v55 = vpop.permute.xlu2 %797 }
 0x20e   :  { %v1886_v12 = vpop.permute.xlu2 %753  ;;  %v844_v14 = vpop.permute.xlu0 %843 }
 0x20f   :  { %v888_v15 = vpop.permute.xlu1 %887 }
 0x216   :  { %v1888_v21 = vpop.permute.xlu2 %893  ;;  %v1890_v63 = vpop.permute.xlu0 %889 }
 0x217   :  { %v898_v59 = vsel %vm2122_vm3, %v1888_v21, %v888_v15  ;;  %v897_v8 = vsel %vm2123_vm1, %v888_v15, %v1890_v63  ;;  %v916_v53 = vpop.permute.xlu1 %915  ;;  %vm2137_vm3 = vmmov %vm2129_vm4 }
 0x218   :  { %v906_v23 = vrot.slane %v898_v59, 4  ;;  %v903_v51 = vrot.slane %v897_v8, 4  ;;  %vm2138_vm1 = vmmov %vm2132_vm7 }
 0x21a   :  { %914 = vst [vmem:[#allocation2 + $0x60] sm:$0xf0] %v906_v23 }
 0x21b   :  { %911 = vst [vmem:[#allocation2 + $0x58] sm:$0xf0] %v903_v51 }
 0x21e   :  { %v922_v24 = vpop.permute.xlu2 %921  ;;  %v846_v13 = vpop.permute.xlu0 %845 }
 0x21f   :  { %v926_v26 = vsel %vm2124_vm0, %v922_v24, %v916_v53  ;;  %v853_v17 = vsel %vm2125_vm9, %v844_v14, %v846_v13  ;;  %v918_v49 = vpop.permute.xlu1 %917  ;;  %vm2139_vm0 = vmmov %vm2138_vm1  ;;  %vm2140_vm9 = vcmp.lt.s32.totalorder %v1355_v10, 17 }
 0x220   :  { %930 = vst [vmem:[#allocation2 + $0x90] sm:$0xf] %v926_v26  ;;  %v859_v47 = vrot.slane %v853_v17, 4  ;;  %v925_v56 = vsel %vm2126_vm14, %v916_v53, %v918_v49  ;;  %vm2141_vm14 = vmmov %vm2134_vm5 }
 0x221   :  { %927 = vst [vmem:[#allocation2 + $0x20] sm:$0xf] %v925_v56 }
 0x222   :  { %867 = vst [vmem:[#allocation2 + $0x8] sm:$0xf0] %v859_v47 }
 0x226   :  { %v920_v9 = vpop.permute.xlu2 %919  ;;  %v1904_v52 = vpop.permute.xlu0 %811 }
 0x227   :  { %v923_v27 = vsel %vm2127_vm11, %v920_v9, %v922_v24  ;;  %v924_v19 = vsel %vm2128_vm15, %v918_v49, %v920_v9  ;;  %v821_v35 = vsel %vm2129_vm4, %v1904_v52, %v814_v30  ;;  %v1913_v37 = vpop.permute.xlu1 %769  ;;  %v950_v2 = vld [vmem:[#allocation2 + $0x90] sm:$0xf]  ;;  %vm2142_vm11 = vmmov %vm2134_vm5  ;;  %vm2143_vm15 = vcmp.lt.s32.totalorder %v1355_v10, 112 }
 0x228   :  { %928 = vst [vmem:[#allocation2 + $0x48] sm:$0xf] %v924_v19  ;;  %v828_v20 = vrot.slane %v821_v35, 4  ;;  %v947_v1 = vld [vmem:[#allocation2 + $0x20] sm:$0xf]  ;;  %v970_v38 = vmul.f32 %v1510_v40, %v950_v2  ;;  %vm2144_vm4 = vmmov %vm2143_vm15 }
 0x229   :  { %929 = vst [vmem:[#allocation2 + $0x70] sm:$0xf] %v923_v27  ;;  %v967_v42 = vmul.f32 %v1566_v32, %v947_v1  ;;  %v939_v24 = vld [vmem:[#allocation2 + $0x8] sm:$0xff] }
 0x22a   :  { %836 = vst [vmem:[#allocation2 + $0x68] sm:$0xf0] %v828_v20  ;;  %1131 = vmatpush.msk.msrb.mxu3 %vm2130_vm8, %v970_v38  ;;  %vm2145_vm8 = vcmp.lt.s32.totalorder %v1355_v10, 15 }
 0x22b   :  { %1125 = vmatpush.msk.msrb.mxu0 %vm2131_vm6, %v967_v42  ;;  %vm2146_vm6 = vmmov %vm2145_vm8 }
 0x22e   :  { %v848_v58 = vpop.permute.xlu2 %847  ;;  %v878_v39 = vpop.permute.xlu0 %877 }
 0x22f   :  { %v852_v60 = vsel %vm2132_vm7, %v846_v13, %v848_v58  ;;  %v882_v44 = vsel %vm2133_vm12, %v878_v39, %v872_v62  ;;  %v874_v45 = vpop.permute.xlu1 %873  ;;  %v948_v46 = vld [vmem:[#allocation2 + $0x48] sm:$0xf]  ;;  %vm2147_vm7 = vmmov %vm2137_vm3 }
 0x230   :  { %v860_v61 = vrot.slane %v852_v60, 4  ;;  %886 = vst [vmem:[#allocation2 + $0x60] sm:$0xf] %v882_v44  ;;  %v881_v40 = vsel %vm2134_vm5, %v872_v62, %v874_v45  ;;  %v968_v32 = vmul.f32 %v1571_v33, %v948_v46  ;;  %v949_v48 = vld [vmem:[#allocation2 + $0x70] sm:$0xf]  ;;  %vm2148_vm12 = vmmov %vm2137_vm3 }
 0x231   :  { %883 = vst [vmem:[#allocation2 + $0x58] sm:$0xf] %v881_v40  ;;  %v969_v57 = vmul.f32 %v1538_v11, %v949_v48  ;;  %vm2149_vm5 = vmmov %vm2140_vm9 }
 0x232   :  { %868 = vst [vmem:[#allocation2 + $0x88] sm:$0xf0] %v860_v61  ;;  %1127 = vmatpush.msk.msrb.mxu1 %vm2135_vm13, %v968_v32  ;;  %vm2150_vm13 = vcmp.lt.s32.totalorder %v1355_v10, 16 }
 0x233   :  { %1129 = vmatpush.msk.msrb.mxu2 %vm2136_vm10, %v969_v57  ;;  %vm2151_vm10 = vmmov %vm2150_vm13 }
 0x236   :  { %v1929_v7 = vpop.permute.xlu2 %773  ;;  %v816_v15 = vpop.permute.xlu0 %815 }
 0x237   :  { %v820_v59 = vsel %vm2137_vm3, %v814_v30, %v816_v15  ;;  %v850_v8 = vpop.permute.xlu1 %849  ;;  %v946_v53 = vld [vmem:[#allocation2 + $0x60] sm:$0xff]  ;;  %v959_v30 = vmul.f32 %v1663_v0, %v939_v24  ;;  %vm2152_vm3 = vmmov %vm2149_vm5 }
 0x238   :  { %v829_v62 = vrot.slane %v820_v59, 4  ;;  %v851_v33 = vsel %vm2138_vm1, %v848_v58, %v850_v8  ;;  %v854_v11 = vsel %vm2139_vm0, %v850_v8, %v844_v14  ;;  %v943_v23 = vld [vmem:[#allocation2 + $0x58] sm:$0xff]  ;;  %v966_v51 = vmul.f32 %v1773_v18, %v946_v53  ;;  %vm2153_vm1 = vmmov %vm2152_vm3 }
 0x239   :  { %v861_v13 = vrot.slane %v851_v33, 4  ;;  %v862_v26 = vrot.slane %v854_v11, 4  ;;  %v963_v17 = vmul.f32 %v1656_v6, %v943_v23  ;;  %v940_v44 = vld [vmem:[#allocation2 + $0x88] sm:$0xff]  ;;  %vm2154_vm0 = vmmov %vm2146_vm6 }
 0x23a   :  { %837 = vst [vmem:[#allocation2 + $0x78] sm:$0xf0] %v829_v62  ;;  %1058 = vmatpush.msrb.mxu3 %v966_v51  ;;  %v960_v40 = vmul.f32 %v1726_v50, %v940_v44 }
 0x23b   :  { %869 = vst [vmem:[#allocation2 + $0x28] sm:$0xf0] %v861_v13  ;;  %998 = vmatpush.msrb.mxu0 %v963_v17 }
 0x23c   :  { %870 = vst [vmem:[#allocation2 + $0x40] sm:$0xf0] %v862_v26 }
 0x23d   :  { %999 = vmatpush.msrb.mxu0 %v959_v30 }
 0x23e   :  { %v756_v49 = vpop.permute.xlu2 %755  ;;  %v876_v47 = vpop.permute.xlu0 %875 }
 0x23f   :  { %v760_v14 = vsel %vm2140_vm9, %v1886_v12, %v756_v49  ;;  %v879_v18 = vsel %vm2141_vm14, %v876_v47, %v878_v39  ;;  %v880_v6 = vsel %vm2142_vm11, %v874_v45, %v876_v47  ;;  %v892_v56 = vpop.permute.xlu1 %891  ;;  %vm2155_vm9 = vmmov %vm2154_vm0 }
 0x240   :  { %765 = vst [vmem:[#allocation2 + $0x50] sm:$0xf] %v760_v14  ;;  %v895_v0 = vsel %vm2143_vm15, %v892_v56, %v1888_v21  ;;  %v896_v9 = vsel %vm2144_vm4, %v1890_v63, %v892_v56  ;;  %vm2156_vm14 = vmmov %vm2151_vm10  ;;  %vm2158_vm15 = vcmask 1043456  }
 0x241   :  { %884 = vst [vmem:[#allocation2 + $0x10] sm:$0xf] %v880_v6  ;;  %v904_v27 = vrot.slane %v896_v9, 4  ;;  %v905_v19 = vrot.slane %v895_v0, 4  ;;  %vm2157_vm11 = vmmov %vm2151_vm10 }
 0x242   :  { %885 = vst [vmem:[#allocation2 + $0x98] sm:$0xf] %v879_v18  ;;  %v941_v61 = vld [vmem:[#allocation2 + $0x28] sm:$0xff]  ;;  %vm2159_vm4 = vmmov %vm2158_vm15 }
 0x243   :  { %912 = vst [vmem:[#allocation2 + $0x10] sm:$0xf0] %v904_v27  ;;  %v942_v35 = vld [vmem:[#allocation2 + $0x40] sm:$0xff] }
 0x244   :  { %913 = vst [vmem:[#allocation2 + $0x98] sm:$0xf0] %v905_v19  ;;  %v962_v2 = vmul.f32 %v1753_v43, %v942_v35 }
 0x246   :  { %1059 = vmatpush.msrb.mxu3 %v962_v2  ;;  %v796_v20 = vpop.permute.xlu2 %795  ;;  %v800_v1 = vpop.permute.xlu0 %799 }
 0x247   :  { %v805_v21 = vsel %vm2145_vm8, %v796_v20, %v1884_v55  ;;  %v804_v63 = vsel %vm2146_vm6, %v1884_v55, %v800_v1  ;;  %v818_v38 = vpop.permute.xlu1 %817 }
 0x248   :  { %808 = vst [vmem:[#allocation2 + $0x68] sm:$0xf] %v805_v21  ;;  %v819_v42 = vsel %vm2147_vm7, %v816_v15, %v818_v38  ;;  %v822_v43 = vsel %vm2148_vm12, %v818_v38, %v1904_v52  ;;  %v961_v52 = vmul.f32 %v1731_v29, %v941_v61 }
 0x249   :  { %809 = vst [vmem:[#allocation2 + $0x78] sm:$0xf] %v804_v63  ;;  %v827_v58 = vrot.slane %v822_v43, 4  ;;  %v830_v39 = vrot.slane %v819_v42, 4 }
 0x24a   :  { %v944_v60 = vld [vmem:[#allocation2 + $0x10] sm:$0xff] }
 0x24b   :  { %835 = vst [vmem:[#allocation2 + $0x30] sm:$0xf0] %v827_v58  ;;  %v964_v45 = vmul.f32 %v1714_v36, %v944_v60  ;;  %v945_v46 = vld [vmem:[#allocation2 + $0x98] sm:$0xff] }
 0x24c   :  { %838 = vst [vmem:[#allocation2 + $0x80] sm:$0xf0] %v830_v39  ;;  %v965_v55 = vmul.f32 %v1736_v41, %v945_v46  ;;  %v1078_v36 = vld [vmem:[%s2026_s5] sm:$0xf] }
 0x24d   :  { %1018 = vmatpush.msrb.mxu1 %v964_v45  ;;  %1081 = vperm.xlu1 %1154, %v1078_v36  }
 0x24e   :  { %1038 = vmatpush.msrb.mxu2 %v965_v55  ;;  %v758_v32 = vpop.permute.xlu0 %757 }
 0x24f   :  { %v759_v48 = vsel %vm2149_vm5, %v756_v49, %v758_v32  ;;  %1019 = vmatpush.msrb.mxu1 %v960_v40  ;;  %v772_v57 = vpop.permute.xlu1 %771  ;;  %v936_v15 = vld [vmem:[#allocation2 + $0x68] sm:$0xff] }
 0x250   :  { %766 = vst [vmem:[#allocation2 + $0x18] sm:$0xf] %v759_v48  ;;  %1039 = vmatpush.msrb.mxu2 %v961_v52  ;;  %v775_v50 = vsel %vm2150_vm13, %v772_v57, %v1929_v7  ;;  %v776_v29 = vsel %vm2151_vm10, %v1913_v37, %v772_v57  ;;  %v956_v41 = vmul.f32 %v1839_v28, %v936_v15  ;;  %v937_v59 = vld [vmem:[#allocation2 + $0x78] sm:$0xff] }
 0x251   :  { %v785_v8 = vrot.slane %v776_v29, 4  ;;  %v786_v53 = vrot.slane %v775_v50, 4  ;;  %v957_v62 = vmul.f32 %v1743_v54, %v937_v59 }
 0x252   :  { %1020 = vmatpush.msrb.mxu1 %v956_v41 }
 0x253   :  { %793 = vst [vmem:[#allocation2 + $0x50] sm:$0xf0] %v785_v8  ;;  %1040 = vmatpush.msrb.mxu2 %v957_v62 }
 0x254   :  { %794 = vst [vmem:[#allocation2 + $0x18] sm:$0xf0] %v786_v53 }
 0x256   :  { %v752_v33 = vpop.permute.xlu0 %751 }
 0x257   :  { %v761_v11 = vsel %vm2152_vm3, %v752_v33, %v1886_v12  ;;  %v762_v23 = vsel %vm2153_vm1, %v758_v32, %v752_v33  ;;  %v802_v51 = vpop.permute.xlu1 %801  ;;  %v750_v12 = vld [vmem:[%s2027_s2] sm:$0xf] }
 0x258   :  { %763 = vst [vmem:[#allocation2] sm:$0xf] %v762_v23  ;;  %v803_v28 = vsel %vm2154_vm0, %v800_v1, %v802_v51  ;;  %v806_v54 = vsel %vm2155_vm9, %v802_v51, %v796_v20 }
 0x259   :  { %764 = vst [vmem:[#allocation2 + $0x38] sm:$0xf] %v761_v11 }
 0x25a   :  { %807 = vst [vmem:[#allocation2 + $0x30] sm:$0xf] %v806_v54  ;;  %v933_v24 = vld [vmem:[#allocation2 + $0x50] sm:$0xff] }
 0x25b   :  { %810 = vst [vmem:[#allocation2 + $0x80] sm:$0xf] %v803_v28  ;;  %v953_v13 = vmul.f32 %v1799_v4, %v933_v24  ;;  %v934_v6 = vld [vmem:[#allocation2 + $0x18] sm:$0xff] }
 0x25c   :  { %v954_v0 = vmul.f32 %v1810_v22, %v934_v6 }
 0x25d   :  { %1041 = vmatpush.msrb.mxu2 %v953_v13 }
 0x25e   :  { %1130 = vmatmul.msk.f32.vlgmr.msrb.gmra.mxu2 %vm629_vm2, %v750_v12 }
 0x25f   :  { %v768_v26 = vpop.permute.xlu1 %767 }
 0x260   :  { %v777_v17 = vsel %vm2156_vm14, %v768_v26, %v1913_v37  ;;  %v778_v30 = vsel %vm2157_vm11, %v1929_v7, %v768_v26 }
 0x261   :  { %v783_v49 = vrot.slane %v778_v30, 4  ;;  %v784_v47 = vrot.slane %v777_v17, 4  ;;  %v935_v14 = vld [vmem:[#allocation2 + $0x30] sm:$0xff] }
 0x262   :  { %v955_v4 = vmul.f32 %v1832_v25, %v935_v14  ;;  %v938_v18 = vld [vmem:[#allocation2 + $0x80] sm:$0xff] }
 0x263   :  { %791 = vst [vmem:[#allocation2] sm:$0xf0] %v783_v49  ;;  %v958_v56 = vmul.f32 %v1796_v16, %v938_v18  ;;  %v1166_v16 = vmov 839922192  }
 0x264   :  { %792 = vst [vmem:[#allocation2 + $0x38] sm:$0xf0] %v784_v47  ;;  %1000 = vmatpush.msrb.mxu0 %v955_v4  ;;  %v1084_v25 = vunpack.c.l.s4 %v1166_v16 }
 0x265   :  { %1060 = vmatpush.msrb.mxu3 %v958_v56 }
 0x266   :  { %v1085_v27 = vunpack.c.0.s8 %v1084_v25 }
 0x267   :  { %1061 = vmatpush.msrb.mxu3 %v954_v0 }
 0x268   :  { %1132 = vmatmul.msk.f32.vlgmr.msrb.gmra.mxu3 %vm629_vm2, %v750_v12 }
 0x26a   :  { %v931_v10 = vld [vmem:[#allocation2] sm:$0xff] }
 0x26b   :  { %v951_v37 = vmul.f32 %v1843_v31, %v931_v10  ;;  %v932_v7 = vld [vmem:[#allocation2 + $0x38] sm:$0xff] }
 0x26c   :  { %v952_v9 = vmul.f32 %v1847_v34, %v932_v7 }
 0x26d   :  { %1001 = vmatpush.msrb.mxu0 %v951_v37 }
 0x26e   :  { %1021 = vmatpush.msrb.mxu1 %v952_v9  ;;  %1126 = vmatmul.msk.f32.vlgmr.msrb.gmra.mxu0 %vm629_vm2, %v750_v12 }
 0x26f   :  { %1128 = vmatmul.msk.f32.vlgmr.msrb.gmra.mxu1 %vm629_vm2, %v750_v12 }
 0x2bf   :  { %v1082_v19 = vpop.permute.xlu1 %1081 }
 0x2c0   :  { %v1086_v31 = vperm.slane %v1082_v19, %v1085_v27 }
 0x2e1   :  { %v1043_v35 = vpop.f32.mrf.mxu2 }
 0x2eb   :  { %v1063_v22 = vpop.f32.mrf.mxu3  ;;  %v1003_v1 = vpop.f32.mrf.mxu0 }
 0x2ec   :  { %v1023_v2 = vpop.f32.mrf.mxu1  ;;  %v1071_v20 = vrot.slane %v1063_v22, 4 }
 0x2ed   :  { %v1070_v21 = vrot.slane %v1023_v2, 4 }
 0x2ee   :  { %v1073_v63 = vsel %vm2158_vm15, %v1043_v35, %v1071_v20 }
 0x2ef   :  { %v1072_v34 = vsel %vm2159_vm4, %v1003_v1, %v1070_v21  ;;  %v1077_v38 = vadd.f32 %v1073_v63, %v1223_v3 }
 0x2f0   :  { %v1076_v42 = vadd.f32 %v1072_v34, %v1234_v5 }
 0x2f1   :  { %v1089_v43 = vadd.f32 %v1086_v31, %v1077_v38 }
 0x2f2   :  { %v1088_v58 = vadd.f32 %v1086_v31, %v1076_v42 }
 0x2f3   :  { %1091 = vst [vmem:[%s2028_s8 + $0x8] sm:$0xff] %v1089_v43 }
 0x2f4   :  { %1090 = vst [vmem:[%s2028_s8] sm:$0xff] %v1088_v58 }

</bundles_post_ra>
